<compile_context>
chip_gen: v7x
topology: tpu7x:2x2x1
jax: 0.10.0
libtpu: 0.0.40
codegen_flags: <defaults>
</compile_context>

<pallas_src>
import functools

import jax
import jax.numpy as jnp
from jax.experimental import pallas as pl
from jax.experimental.pallas import tpu as pltpu


# ---------------------------------------------------------------------------
# Generation-aware configuration (one-time, cached).
# ---------------------------------------------------------------------------
@functools.lru_cache(maxsize=None)
def _vmem_budget_bytes():
    """~75% of this generation's per-core VMEM (v5e/v6e: 128 MiB, v7x: 64 MiB/TC)."""
    try:
        cap = int(pltpu.get_tpu_info().vmem_capacity_bytes)
    except Exception:  # noqa: BLE001 - hardware query fallback only
        cap = 64 * 1024 * 1024  # conservative: v7x per-TC VMEM
    return max((cap * 3) // 4, 16 * 1024 * 1024)


@functools.lru_cache(maxsize=None)
def _buffered_one_supported():
    """One-time feature probe: can constant-index blocks be single-buffered via
    pipeline_mode=pl.Buffered(1)?  Replaces the previous broad try/except around the
    real kernel (which doubled tracing and could mask genuine bugs)."""
    if not hasattr(pl, "Buffered"):
        return False

    def probe(x_ref, w_ref, o_ref):
        o_ref[...] = x_ref[...] + w_ref[...]

    try:
        x = jnp.zeros((16, 128), jnp.float32)
        w = jnp.zeros((8, 128), jnp.float32)
        f = pl.pallas_call(
            probe,
            out_shape=jax.ShapeDtypeStruct((16, 128), jnp.float32),
            grid=(2,),
            in_specs=[
                pl.BlockSpec((8, 128), lambda i: (i, 0)),
                pl.BlockSpec((8, 128), lambda i: (0, 0),
                             pipeline_mode=pl.Buffered(1)),
            ],
            out_specs=pl.BlockSpec((8, 128), lambda i: (i, 0)),
        )
        jax.block_until_ready(f(x, w))
        return True
    except Exception:  # noqa: BLE001 - feature probe only
        return False


def _const_spec(shape, index_map, single_buffer):
    """Blocks whose index never changes (resident weights / ctx): single-buffer them
    when supported so the pipeline does not allocate a useless second VMEM copy."""
    if single_buffer:
        return pl.BlockSpec(shape, index_map, pipeline_mode=pl.Buffered(1))
    return pl.BlockSpec(shape, index_map)


# ---------------------------------------------------------------------------
# Math helpers.
# ---------------------------------------------------------------------------
def _elu(x):
    # F.elu(alpha=1.0): x for x>0, expm1(x) for x<=0.  One EUP exp; the min() clamp
    # keeps the (discarded) negative branch finite for large positive x.
    return jnp.where(x > 0, x, jnp.exp(jnp.minimum(x, 0.0)) - 1.0)


def _pick_batch_tile(batch, prefer_split):
    cands = (256, 128, 64, 32, 16, 8)
    if prefer_split:
        # Fused path only: >=2 grid steps lets a "parallel" batch axis feed both v7x
        # TensorCores; on 1-TC v5e/v6e the extra step costs ~0.35us (negligible).
        for c in cands:
            if batch % c == 0 and batch // c >= 2:
                return c
    for c in cands:
        if batch % c == 0:
            return c
    return None


def _pick_o_tile(O, C, B, tb, x_isz, w1_isz, w2_isz, budget):
    """Largest lane-dense output tile whose streamed-path footprint fits the budget."""
    ctx_bytes = B * C * 4
    for to in (1024, 512, 256, 128):
        if O % to:
            continue
        # Pass 1: double-buffered x / w1 tiles + resident f32 ctx + bias.
        p1 = 2 * tb * to * x_isz + 2 * to * C * w1_isz + ctx_bytes + 2 * C * 4
        # Pass 2: resident ctx (counted x2, conservatively) + double-buffered
        #         w2 / b2 / x / out tiles.
        p2 = (2 * ctx_bytes + 2 * C * to * w2_isz + 2 * to * 4
              + 2 * tb * to * x_isz + 2 * tb * to * x_isz)
        if max(p1, p2) <= budget:
            return to
    return None


# ---------------------------------------------------------------------------
# Fused path: both weights resident in VMEM, grid over batch tiles only.
# ---------------------------------------------------------------------------
def _fused_kernel(x_ref, w1_ref, b1_ref, w2_ref, b2_ref, o_ref):
    x = x_ref[...].astype(jnp.float32)                     # (tb, O), identity
    h = jax.nn.sigmoid(x)                                  # f32 elementwise
    ctx = jnp.dot(h.astype(w1_ref.dtype), w1_ref[...],     # (bf16 x bf16) -> f32 acc
                  preferred_element_type=jnp.float32) + b1_ref[...]
    ctx = _elu(ctx)                                        # f32
    out = jnp.dot(ctx.astype(w2_ref.dtype), w2_ref[...],
                  preferred_element_type=jnp.float32) + b2_ref[...]
    o_ref[...] = (out + x).astype(o_ref.dtype)


def _cornet_fused(x, w1, b1, w2, b2, tb, single_buffer, vmem_limit):
    B, O = x.shape
    C = w1.shape[1]
    const = lambda shp, imap: _const_spec(shp, imap, single_buffer)  # noqa: E731
    return pl.pallas_call(
        _fused_kernel,
        out_shape=jax.ShapeDtypeStruct((B, O), x.dtype),
        grid=(B // tb,),
        in_specs=[
            pl.BlockSpec((tb, O), lambda i: (i, 0)),   # x (batch-tiled)
            const((O, C), lambda i: (0, 0)),           # w1 (resident)
            const((1, C), lambda i: (0, 0)),           # b1
            const((C, O), lambda i: (0, 0)),           # w2 (resident)
            const((1, O), lambda i: (0, 0)),           # b2
        ],
        out_specs=pl.BlockSpec((tb, O), lambda i: (i, 0)),
        compiler_params=pltpu.CompilerParams(
            dimension_semantics=("parallel",),
            vmem_limit_bytes=vmem_limit),
    )(x, w1, b1, w2, b2)


# ---------------------------------------------------------------------------
# Streamed path (large output_size): single-pass weight streaming.
#   Pass 1: grid (O//to, B//tb), batch innermost, w1 K-tile constant along it,
#           (B, C) f32 ctx output doubles as the accumulator  -> w1 read once.
#   Pass 2: grid (O//to, B//tb), batch innermost, ctx resident, w2 N-tile constant
#           along the inner axis                              -> w2 read once.
# Both passes keep the batch axis "arbitrary" so the dominant O*C weight stream is
# not duplicated across v7x TensorCores (pass 2's O axis is "parallel": each TC
# streams a disjoint half of w2).
# ---------------------------------------------------------------------------
def _cornet_streamed(x, w1, b1, w2, b2, tb, to, single_buffer, vmem_limit):
    B, O = x.shape
    C = w1.shape[1]
    n_k = O // to
    n_b = B // tb

    def ctx_kernel(x_ref, w1_ref, b1_ref, ctx_ref):
        k = pl.program_id(0)
        i = pl.program_id(1)
        rows = pl.ds(pl.multiple_of(i * tb, tb), tb)
        h = jax.nn.sigmoid(x_ref[...].astype(jnp.float32))
        part = jnp.dot(h.astype(w1_ref.dtype), w1_ref[...],
                       preferred_element_type=jnp.float32)

        @pl.when(k == 0)
        def _():
            ctx_ref[rows, :] = part

        @pl.when(k > 0)
        def _():
            ctx_ref[rows, :] = ctx_ref[rows, :] + part

        @pl.when(k == n_k - 1)
        def _():
            ctx_ref[rows, :] = _elu(ctx_ref[rows, :] + b1_ref[...])

    ctx = pl.pallas_call(
        ctx_kernel,
        out_shape=jax.ShapeDtypeStruct((B, C), jnp.float32),   # ctx kept in f32
        grid=(n_k, n_b),                                       # batch innermost
        in_specs=[
            pl.BlockSpec((tb, to), lambda k, i: (i, k)),       # x K-tile (read once)
            pl.BlockSpec((to, C), lambda k, i: (k, 0)),        # w1 K-tile (read once)
            pl.BlockSpec((1, C), lambda k, i: (0, 0)),         # b1
        ],
        out_specs=pl.BlockSpec((B, C), lambda k, i: (0, 0)),   # resident accumulator
        compiler_params=pltpu.CompilerParams(
            dimension_semantics=("arbitrary", "arbitrary"),
            vmem_limit_bytes=vmem_limit),
    )(x, w1, b1)

    def out_kernel(ctx_ref, w2_ref, b2_ref, x_ref, o_ref):
        i = pl.program_id(1)
        rows = pl.ds(pl.multiple_of(i * tb, tb), tb)
        out = jnp.dot(ctx_ref[rows, :].astype(w2_ref.dtype), w2_ref[...],
                      preferred_element_type=jnp.float32)
        o_ref[...] = (out + b2_ref[...]
                      + x_ref[...].astype(jnp.float32)).astype(o_ref.dtype)

    return pl.pallas_call(
        out_kernel,
        out_shape=jax.ShapeDtypeStruct((B, O), x.dtype),
        grid=(n_k, n_b),                                       # batch innermost
        in_specs=[
            _const_spec((B, C), lambda j, i: (0, 0), single_buffer),  # ctx (resident)
            pl.BlockSpec((C, to), lambda j, i: (0, j)),        # w2 N-tile (read once)
            pl.BlockSpec((1, to), lambda j, i: (0, j)),        # b2 N-tile
            pl.BlockSpec((tb, to), lambda j, i: (i, j)),       # x (identity)
        ],
        out_specs=pl.BlockSpec((tb, to), lambda j, i: (i, j)),  # lane-dense output
        compiler_params=pltpu.CompilerParams(
            dimension_semantics=("parallel", "arbitrary"),
            vmem_limit_bytes=vmem_limit),
    )(ctx, w2, b2, x)


# ---------------------------------------------------------------------------
# Public wrappers.
# ---------------------------------------------------------------------------
def prepare_cornet_params(w1, b1, w2, b2, *, weight_dtype=jnp.bfloat16):
    """One-time parameter prep (call OUTSIDE the hot loop): casts the two O x C
    weight matrices to bf16 once instead of per forward call, and reshapes biases
    to (1, features) f32.  Matmuls accumulate in f32 inside the kernels."""
    return (w1.astype(weight_dtype),
            b1.astype(jnp.float32).reshape(1, -1),
            w2.astype(weight_dtype),
            b2.astype(jnp.float32).reshape(1, -1))


def cornet_block(x, w1, b1, w2, b2, *, tb=None, block_o=None, force_streamed=False):
    """CorNetBlock forward.

    x: (B, O) logits; w1: (O, C); b1: (C,) or (1, C); w2: (C, O); b2: (O,) or (1, O).
    Weights are already transposed (in_features x out_features); pass them in bf16
    (see prepare_cornet_params) to halve weight HBM traffic.
    """
    B, O = x.shape
    O_w, C = w1.shape
    assert O_w == O and w2.shape == (C, O), "weight shapes must be (O,C) and (C,O)"
    b1 = jnp.asarray(b1, jnp.float32).reshape(1, C)
    b2 = jnp.asarray(b2, jnp.float32).reshape(1, O)

    budget = _vmem_budget_bytes()
    single_buffer = _buffered_one_supported()

    tb_fused = tb if tb is not None else _pick_batch_tile(B, prefer_split=True)
    if tb_fused is None or B % tb_fused != 0:
        raise ValueError("batch must be a multiple of 8 (got %d)" % B)

    x_isz = x.dtype.itemsize
    wbytes = w1.size * w1.dtype.itemsize + w2.size * w2.dtype.itemsize
    bias_bytes = (b1.size + b2.size) * 4
    wmult = 1 if single_buffer else 2
    fused_bytes = (wmult * (wbytes + bias_bytes)
                   + 2 * tb_fused * O * x_isz      # x, double-buffered
                   + 2 * tb_fused * O * x_isz)     # out, double-buffered
    use_streamed = force_streamed or fused_bytes > budget

    if not use_streamed:
        return _cornet_fused(x, w1, b1, w2, b2, tb_fused, single_buffer, budget)

    # Streamed path: batch axis is a sequential inner loop, so just take the
    # largest batch tile that divides B.
    tb_s = tb if tb is not None else _pick_batch_tile(B, prefer_split=False)
    if tb_s is None or B % tb_s != 0:
        raise ValueError("batch must be a multiple of 8 (got %d)" % B)
    if 2 * B * C * 4 > budget:
        raise ValueError("batch*context_size too large for the resident ctx buffer")
    if block_o is not None:
        to = block_o
        if O % to != 0 or to % 128 != 0:
            raise ValueError("block_o must divide output_size and be a multiple of 128")
    else:
        to = _pick_o_tile(O, C, B, tb_s, x_isz, w1.dtype.itemsize,
                          w2.dtype.itemsize, budget)
        if to is None:
            # TODO(synk): ragged output_size (not a multiple of 128) would need a
            # padded tail tile; raise a clear error instead of silently OOM-ing.
            raise ValueError(
                "output_size=%d has no 128-multiple tile fitting VMEM; the fused "
                "path does not fit either (%d > %d bytes)" % (O, fused_bytes, budget))
    return _cornet_streamed(x, w1, b1, w2, b2, tb_s, to, single_buffer, budget)


def cornet_block_ref(x, w1, b1, w2, b2):
    h = jax.nn.sigmoid(x)
    ctx = jax.nn.elu(h @ w1 + b1)
    return ctx @ w2 + b2 + x


if __name__ == "__main__":
    key = jax.random.PRNGKey(0)
    k1, k2, k3, k4, k5 = jax.random.split(key, 5)

    batch = 128          # small demo shapes
    output_size = 512    # label-distribution size
    context_size = 128

    x = jax.random.normal(k1, (batch, output_size), dtype=jnp.float32)
    # Deterministic "Linear" params, already transposed (in_features x out_features).
    w1 = jax.random.normal(k2, (output_size, context_size), dtype=jnp.float32) * 0.05
    b1 = jax.random.normal(k3, (context_size,), dtype=jnp.float32) * 0.05
    w2 = jax.random.normal(k4, (context_size, output_size), dtype=jnp.float32) * 0.05
    b2 = jax.random.normal(k5, (output_size,), dtype=jnp.float32) * 0.05

    ref = cornet_block_ref(x, w1, b1, w2, b2)

    # One-time bf16 weight prep (hoisted out of the forward call).
    w1p, b1p, w2p, b2p = prepare_cornet_params(w1, b1, w2, b2)

    # Fused (resident-weight) path — auto-selected at this size.
    out_fused = jax.block_until_ready(cornet_block(x, w1p, b1p, w2p, b2p))
    assert out_fused.shape == (batch, output_size)
    assert jnp.allclose(out_fused, ref, atol=2e-2, rtol=2e-2), "fused path mismatch"

    # Streamed (single-pass weight streaming) path — the regime used for huge
    # output_size; forced here with a small O tile to exercise multi-step K/N loops.
    out_streamed = jax.block_until_ready(
        cornet_block(x, w1p, b1p, w2p, b2p, block_o=128, force_streamed=True))
    assert out_streamed.shape == (batch, output_size)
    assert jnp.allclose(out_streamed, ref, atol=2e-2, rtol=2e-2), "streamed path mismatch"

    print("KERNEL_OK")
</pallas_src>

<mosaic_0001>
module attributes {stable_mosaic.version = 11 : i64} {
  func.func @probe(%arg0: i32, %arg1: memref<8x128xf32, #tpu.memory_space<vmem>>, %arg2: memref<8x128xf32, #tpu.memory_space<vmem>>, %arg3: memref<8x128xf32, #tpu.memory_space<vmem>>) attributes {dimension_semantics = [#tpu.dimension_semantics<arbitrary>], iteration_bounds = array<i64: 2>, scalar_prefetch = 0 : i64, scratch_operands = 0 : i64, tpu.core_type = #tpu.core_type<tc>, window_params = [{transform_indices = @transform_0, window_bounds = array<i64: 8, 128>}, {pipeline_mode = #tpu.pipeline_mode<synchronous>, transform_indices = @transform_1, window_bounds = array<i64: 8, 128>}, {transform_indices = @transform_2, window_bounds = array<i64: 8, 128>}]} {
    %c0 = arith.constant 0 : index
    %c0_0 = arith.constant 0 : index
    %0 = vector.load %arg1[%c0, %c0_0] : memref<8x128xf32, #tpu.memory_space<vmem>>, vector<8x128xf32>
    %c0_1 = arith.constant 0 : index
    %c0_2 = arith.constant 0 : index
    %1 = vector.load %arg2[%c0_1, %c0_2] : memref<8x128xf32, #tpu.memory_space<vmem>>, vector<8x128xf32>
    %2 = arith.addf %0, %1 : vector<8x128xf32>
    %c0_3 = arith.constant 0 : index
    %c0_4 = arith.constant 0 : index
    %3 = vector.load %arg3[%c0_3, %c0_4] : memref<8x128xf32, #tpu.memory_space<vmem>>, vector<8x128xf32>
    tpu.vector_store %arg3[%c0_3, %c0_4], %2 {strides = array<i32>} : memref<8x128xf32, #tpu.memory_space<vmem>>, vector<8x128xf32>,
    return
  }
  func.func @transform_0(%arg0: i32) -> (i32, i32) {
    %c0_i32 = arith.constant 0 : i32
    %c0_i32_0 = arith.constant 0 : i32
    return %arg0, %c0_i32 : i32, i32
  }
  func.func @transform_1(%arg0: i32) -> (i32, i32) {
    %c0_i32 = arith.constant 0 : i32
    %c0_i32_0 = arith.constant 0 : i32
    %c0_i32_1 = arith.constant 0 : i32
    return %c0_i32, %c0_i32_0 : i32, i32
  }
  func.func @transform_2(%arg0: i32) -> (i32, i32) {
    %c0_i32 = arith.constant 0 : i32
    %c0_i32_0 = arith.constant 0 : i32
    return %arg0, %c0_i32 : i32, i32
  }
}

module attributes {stable_mosaic.version = 11 : i64} {
  func.func @_fused_kernel(%arg0: i32, %arg1: memref<64x512xf32, #tpu.memory_space<vmem>>, %arg2: memref<512x128xbf16, #tpu.memory_space<vmem>>, %arg3: memref<1x128xf32, #tpu.memory_space<vmem>>, %arg4: memref<128x512xbf16, #tpu.memory_space<vmem>>, %arg5: memref<1x512xf32, #tpu.memory_space<vmem>>, %arg6: memref<64x512xf32, #tpu.memory_space<vmem>>) attributes {dimension_semantics = [#tpu.dimension_semantics<parallel>], iteration_bounds = array<i64: 2>, scalar_prefetch = 0 : i64, scratch_operands = 0 : i64, tpu.core_type = #tpu.core_type<tc>, window_params = [{transform_indices = @transform_0, window_bounds = array<i64: 64, 512>}, {pipeline_mode = #tpu.pipeline_mode<synchronous>, transform_indices = @transform_1, window_bounds = array<i64: 512, 128>}, {pipeline_mode = #tpu.pipeline_mode<synchronous>, transform_indices = @transform_2, window_bounds = array<i64: 1, 128>}, {pipeline_mode = #tpu.pipeline_mode<synchronous>, transform_indices = @transform_3, window_bounds = array<i64: 128, 512>}, {pipeline_mode = #tpu.pipeline_mode<synchronous>, transform_indices = @transform_4, window_bounds = array<i64: 1, 512>}, {transform_indices = @transform_5, window_bounds = array<i64: 64, 512>}]} {
    %c0 = arith.constant 0 : index
    %c0_0 = arith.constant 0 : index
    %0 = vector.load %arg1[%c0, %c0_0] : memref<64x512xf32, #tpu.memory_space<vmem>>, vector<64x512xf32>
    %1 = arith.negf %0 : vector<64x512xf32>
    %2 = math.exp %1 : vector<64x512xf32>
    %cst = arith.constant 1.000000e+00 : f32
    %3 = vector.broadcast %cst : f32 to vector<64x512xf32>
    %4 = arith.addf %3, %2 : vector<64x512xf32>
    %5 = arith.divf %3, %4 : vector<64x512xf32>
    %6 = arith.truncf %5 : vector<64x512xf32> to vector<64x512xbf16>
    %c0_1 = arith.constant 0 : index
    %c0_2 = arith.constant 0 : index
    %7 = vector.load %arg2[%c0_1, %c0_2] : memref<512x128xbf16, #tpu.memory_space<vmem>>, vector<512x128xbf16>
    %cst_3 = arith.constant dense<0.000000e+00> : vector<64x128xf32>
    %8 = tpu.matmul %6, %7, %cst_3 {dimension_numbers = #tpu.dot_dimension_numbers<[1], [0], [0], [1], [0, 0, 1, 1], [], []>} : vector<64x512xbf16>, vector<512x128xbf16>, vector<64x128xf32> -> vector<64x128xf32>
    %c0_4 = arith.constant 0 : index
    %c0_5 = arith.constant 0 : index
    %9 = vector.load %arg3[%c0_4, %c0_5] : memref<1x128xf32, #tpu.memory_space<vmem>>, vector<1x128xf32>
    %10 = vector.broadcast %9 : vector<1x128xf32> to vector<64x128xf32>
    %11 = arith.addf %8, %10 : vector<64x128xf32>
    %cst_6 = arith.constant 0.000000e+00 : f32
    %12 = vector.broadcast %cst_6 : f32 to vector<64x128xf32>
    %13 = arith.cmpf ogt, %11, %12 : vector<64x128xf32>
    %cst_7 = arith.constant 0.000000e+00 : f32
    %14 = vector.broadcast %cst_7 : f32 to vector<64x128xf32>
    %15 = arith.minimumf %11, %14 : vector<64x128xf32>
    %16 = math.exp %15 : vector<64x128xf32>
    %cst_8 = arith.constant 1.000000e+00 : f32
    %17 = vector.broadcast %cst_8 : f32 to vector<64x128xf32>
    %18 = arith.subf %16, %17 : vector<64x128xf32>
    %19 = arith.select %13, %11, %18 : vector<64x128xi1>, vector<64x128xf32>
    %20 = arith.truncf %19 : vector<64x128xf32> to vector<64x128xbf16>
    %c0_9 = arith.constant 0 : index
    %c0_10 = arith.constant 0 : index
    %21 = vector.load %arg4[%c0_9, %c0_10] : memref<128x512xbf16, #tpu.memory_space<vmem>>, vector<128x512xbf16>
    %cst_11 = arith.constant dense<0.000000e+00> : vector<64x512xf32>
    %22 = tpu.matmul %20, %21, %cst_11 {dimension_numbers = #tpu.dot_dimension_numbers<[1], [0], [0], [1], [0, 0, 1, 1], [], []>} : vector<64x128xbf16>, vector<128x512xbf16>, vector<64x512xf32> -> vector<64x512xf32>
    %c0_12 = arith.constant 0 : index
    %c0_13 = arith.constant 0 : index
    %23 = vector.load %arg5[%c0_12, %c0_13] : memref<1x512xf32, #tpu.memory_space<vmem>>, vector<1x512xf32>
    %24 = vector.broadcast %23 : vector<1x512xf32> to vector<64x512xf32>
    %25 = arith.addf %22, %24 : vector<64x512xf32>
    %26 = arith.addf %25, %0 : vector<64x512xf32>
    %c0_14 = arith.constant 0 : index
    %c0_15 = arith.constant 0 : index
    %27 = vector.load %arg6[%c0_14, %c0_15] : memref<64x512xf32, #tpu.memory_space<vmem>>, vector<64x512xf32>
    tpu.vector_store %arg6[%c0_14, %c0_15], %26 {strides = array<i32>} : memref<64x512xf32, #tpu.memory_space<vmem>>, vector<64x512xf32>,
    return
  }
  func.func @transform_0(%arg0: i32) -> (i32, i32) {
    %c0_i32 = arith.constant 0 : i32
    %c0_i32_0 = arith.constant 0 : i32
    return %arg0, %c0_i32 : i32, i32
  }
  func.func @transform_1(%arg0: i32) -> (i32, i32) {
    %c0_i32 = arith.constant 0 : i32
    %c0_i32_0 = arith.constant 0 : i32
    %c0_i32_1 = arith.constant 0 : i32
    return %c0_i32, %c0_i32_0 : i32, i32
  }
  func.func @transform_2(%arg0: i32) -> (i32, i32) {
    %c0_i32 = arith.constant 0 : i32
    %c0_i32_0 = arith.constant 0 : i32
    %c0_i32_1 = arith.constant 0 : i32
    return %c0_i32, %c0_i32_0 : i32, i32
  }
  func.func @transform_3(%arg0: i32) -> (i32, i32) {
    %c0_i32 = arith.constant 0 : i32
    %c0_i32_0 = arith.constant 0 : i32
    %c0_i32_1 = arith.constant 0 : i32
    return %c0_i32, %c0_i32_0 : i32, i32
  }
  func.func @transform_4(%arg0: i32) -> (i32, i32) {
    %c0_i32 = arith.constant 0 : i32
    %c0_i32_0 = arith.constant 0 : i32
    %c0_i32_1 = arith.constant 0 : i32
    return %c0_i32, %c0_i32_0 : i32, i32
  }
  func.func @transform_5(%arg0: i32) -> (i32, i32) {
    %c0_i32 = arith.constant 0 : i32
    %c0_i32_0 = arith.constant 0 : i32
    return %arg0, %c0_i32 : i32, i32
  }
}

</mosaic_0001>

<bundles_post_ra>
// kernel: tpu_custom_call.1
= control target key start
LH: loop header
LB: loop body
LE: loop exit
PB: predicated region body
PF: predicated region fallthrough
CT: control target
= control target key end

     0   :  { %7 = vsyncpa [#allocation3], 0  ;;  %s690_s0 = inlined_call_operand.hbm [shape: f32[16,128], index: 0, kind: input, shape index: {}]   ;;  %s691_s1 = inlined_call_operand.hbm [shape: f32[8,128], index: 1, kind: input, shape index: {}]   ;;  %s692_s2 = inlined_call_operand.hbm [shape: f32[16,128], index: 2, kind: output, shape index: {}]  }
   0x1   :  { %9 = vsyncpa [#allocation3 + $0x1], 0 }
   0x2   :  { %10 = vsyncpa [#allocation6], 0 }
   0x3   :  { %11 = vsyncpa [#allocation4], 0 }
   0x4   :  { %13 = vsyncpa [#allocation4 + $0x1], 0  ;;  %s489_s9 = smov 0   ;;  %s491_s10 = smov 0  }
   0x5   :  { %s493_s11 = smov 0   ;;  %s495_s12 = smov 0  }
   0x6 LB: > { %s510_s13 = sadd.s32 4294967295, %s469_s12   ;;  %s270_s14 = sadd.s32 4294967294, %s469_s12   ;;  %s469_s12 = sphi %s495_s12, %s716_s12   ;;  %s465_s11 = sphi %s493_s11, %s715_s11   ;;  %s461_s10 = sphi %s491_s10, %s714_s10   ;;  %s457_s9 = sphi %s489_s9, %s713_s9  }
   0x7   : > { %p39_p0 = scmp.ne.s32.totalorder %s461_s10, %s457_s9  ;;  %p693_p1 = scmp.eq.s32.totalorder %s510_s13, 0 }
   0x8   : > { %p90_p3 = scmp.eq.s32.totalorder %s270_s14, 1  ;;  %p271_p5 = scmp.ge.s32.totalorder %s469_s12, 1 }
   0x9   : > { %p519_p4 = por %p693_p1, %p39_p0  ;;  %p97_p7 = scmp.lt.s32.totalorder %s469_s12, 3 }
   0xa   : > { %p524_p6 = por %p90_p3, %p39_p0  ;;  %s471_s18 = smov [#allocation5]  }
   0xb   : > { %s696_s15 = scalar_select %p519_p4, 1, 0 }
   0xc   : > { %s697_s16 = scalar_select %p524_p6, 1, 0 }
   0xd   : > { %p529_p8 = pnand %p271_p5, %p97_p7  ;;  %s110_s19 = sshll.u32 %s471_s18, 4  ;;  %s111_s19 = int_to_ptr.vmem [resolvable:$true] %s110_s19 }
   0xe   : > { %s537_s20 = sadd.s32 1, %s469_s12   ;;  %s26_s24 = sadd.s32 1, %s465_s11 }
   0xf   : > { %s698_s17 = scalar_select %p529_p8, 1, 0 }
  0x10   : > { %p292_p10 = pneg %p529_p8  ;;  %s23_s22 = ssub.s32 %s469_s12, %s537_s20 }
  0x11   : > { %p547_p12 = scmp.eq.s32.totalorder %s23_s22, 0  ;;  %s341_s27 = scalar_lea.hbm %s691_s1, 128 }
  0x12   : > { %p541_p11 = pnand %p292_p10, %p693_p1  ;;  %p342_p0 = scmp.ne.s32.totalorder %s691_s1, %s341_s27 }
  0x13   : > { %s700_s23 = scalar_select %p547_p12, 1, 0 }
  0x14   : > { %p343_p3 = pneg %p541_p11  ;;  %p348_p10 = scmp.lt.u32.totalorder %s341_s27, %s691_s1 }
  0x16   : > { %p344_p5 = pnand %p343_p3, %p342_p0 }
  0x18   : > { %p345_p7 = pneg %p344_p5 }
  0x1a   : > { %p350_p9 = pnand %p348_p10, %p345_p7 }
  0x1c   : > { %353 = shalt.err (!%p350_p9)
}
  0x1d   : > { %s354_s4 = scalar_lea.vmem %s111_s19, 128  ;;  %p362_p6 = scmp.lt.s32.totalorder %s111_s19, %s111_s19 }
  0x1e   : > { %p355_p1 = scmp.ne.s32.totalorder %s111_s19, %s354_s4  ;;  %p363_p4 = scmp.lt.s32.totalorder %s354_s4, %s354_s4 }
  0x20   : > { %p357_p2 = pnand %p355_p1, %p343_p3  ;;  %p364_p8 = por %p363_p4, %p362_p6 }
  0x22   : > { %p358_p13 = pneg %p357_p2 }
  0x24   : > { %p365_p12 = pnand %p364_p8, %p358_p13 }
  0x26   : > { %368 = shalt.err (!%p365_p12)
}
  0x27   : > { %295 = dma.hbm_to_vmem [thread:$0]  (!%p541_p11), %s691_s1, 128, %s111_s19, [#allocation6]  }
  0x28   : > { %p701_p1 = scmp.ne.s32.totalorder %s700_s23, 0  ;;  %p34_p2 = scmp.eq.s32.totalorder %s469_s12, 0 }
  0x29   : > { %p702_p4 = scmp.ne.s32.totalorder %s465_s11, %s461_s10  ;;  %p703_p6 = scmp.eq.s32.totalorder %s510_s13, 1 }
  0x2a   : > { %s573_s7 = scalar_select %p701_p1, %s465_s11, %s26_s24  }
  0x2b   : > { %p581_p8 = por %p703_p6, %p702_p4  ;;  %p305_p9 = scmp.lt.s32.totalorder %s469_s12, 2 }
  0x2c   : > { %s121_s14 = sand.u32 1, %s465_s11   ;;  %p705_p12 = pmov %p702_p4 }
  0x2d   : > { %s274_s18 = sshll.u32 %s121_s14, 3  ;;  %s275_s21 = sshll.u32 %s469_s12, 7 }
  0x2e   : > { %p35_p13 = por %p34_p2, %p705_p12  ;;  %s594_s19 = scalar_lea.hbm %s690_s0, %s275_s21 }
  0x2f   : > { %s125_s23 = scalar_lea.vmem [#allocation2], %s274_s18  ;;  %s122_s27 = scalar_lea.sflag [#allocation3], %s121_s14 }
  0x30   : > { %s132_s24 = sshll.u32 %s125_s23, 4  ;;  %p596_p11 = pnand %p305_p9, %p35_p13  ;;  %s600_s24 = int_to_ptr.vmem [resolvable:$true] %s132_s24 }
  0x31   : > { %s369_s28 = scalar_lea.hbm %s594_s19, 128  ;;  %s374_s3 = scalar_lea.hbm %s690_s0, 256 }
  0x32   : > { %p370_p0 = scmp.ne.s32.totalorder %s594_s19, %s369_s28  ;;  %p371_p3 = pneg %p596_p11 }
  0x33   : > { %p375_p10 = scmp.lt.u32.totalorder %s594_s19, %s690_s0  ;;  %p376_p1 = scmp.lt.u32.totalorder %s374_s3, %s369_s28 }
  0x34   : > { %p372_p5 = pnand %p371_p3, %p370_p0  ;;  %p378_p4 = scmp.lt.u32.totalorder %s369_s28, %s594_s19 }
  0x35   : > { %p377_p2 = por %p376_p1, %p375_p10 }
  0x36   : > { %p373_p7 = pneg %p372_p5 }
  0x37   : > { %p379_p6 = por %p378_p4, %p377_p2 }
  0x39   : > { %p380_p9 = pnand %p379_p6, %p373_p7 }
  0x3b   : > { %383 = shalt.err (!%p380_p9)
}
  0x3c   : > { %s384_s6 = scalar_lea.vmem %s600_s24, 128  ;;  %s472_s14 = smov [#allocation2]  }
  0x3d   : > { %p385_p12 = scmp.ne.s32.totalorder %s600_s24, %s384_s6  ;;  %s389_s18 = sshll.u32 %s472_s14, 4  ;;  %s390_s18 = int_to_ptr.vmem [resolvable:$false] %s389_s18 }
  0x3e   : > { %s391_s21 = scalar_lea.vmem %s390_s18, 256  ;;  %p392_p5 = scmp.lt.s32.totalorder %s600_s24, %s390_s18 }
  0x3f   : > { %p387_p13 = pnand %p385_p12, %p371_p3  ;;  %p393_p10 = scmp.lt.s32.totalorder %s391_s21, %s384_s6 }
  0x41   : > { %p388_p0 = pneg %p387_p13  ;;  %p394_p1 = por %p393_p10, %p392_p5 }
  0x43   : > { %p395_p2 = pnand %p394_p1, %p388_p0 }
  0x45   : > { %398 = shalt.err (!%p395_p2)
}
  0x46   : > { %299 = dma.hbm_to_vmem [thread:$0]  (!%p596_p11), %s594_s19, 128, %s600_s24, %s122_s27  }
  0x47   : > { %p707_p7 = scmp.ne.s32.totalorder %s698_s17, 0 }
  0x48   : > { %s630_s22 = sand.u32 (!%p707_p7), 1, %s461_s10   ;;  %p708_p3 = scmp.ne.s32.totalorder (!%p707_p7), %s696_s15, 0 }
  0x49   : > { %141 = sbr.rel (%p707_p7) target bundleno = 109 (0x6d), region = 28  ;;  %s277_s25 = sshll.u32 (!%p707_p7), %s630_s22, 3 }
  0x4a   : > { %s144_s23 = scalar_lea.sflag (!%p707_p7), [#allocation3], %s630_s22  ;;  %s147_s28 = scalar_lea.vmem (!%p707_p7), [#allocation2], %s277_s25 }
  0x50   : > { %444 = dma.done.wait (%p708_p3), %s144_s23, 128  }
  0x51   : > { %446 = vsyncadd (%p708_p3), %s144_s23, 4294967168  ;;  %p709_p4 = scmp.eq.s32.totalorder %s510_s13, 0 }
  0x53   : > { %448 = dma.done.wait (%p709_p4), [#allocation6], 128   ;;  %p710_p11 = pmov %p709_p4 }
  0x54   : > { %s171_s17 = scalar_lea.vmem [#allocation7], %s277_s25  ;;  %s281_s24 = sshll.u32 %s510_s13, 7  ;;  %v172_v0 = vld [vmem:[%s147_s28] sm:$0xff]  ;;  %v173_v1 = vld [vmem:[#allocation5] sm:$0xff] }
  0x55   : > { %450 = vsyncadd (%p710_p11), [#allocation6], 4294967168  ;;  %s190_s19 = sshll.u32 %s171_s17, 4  ;;  %v174_v2 = vadd.f32 %v173_v1, %v172_v0  ;;  %s648_s27 = scalar_lea.hbm %s692_s2, %s281_s24  ;;  %s643_s19 = int_to_ptr.vmem [resolvable:$true] %s190_s19 }
  0x56   : > { %s177_s29 = scalar_lea.sflag [#allocation4], %s630_s22  ;;  %s399_s30 = scalar_lea.vmem %s643_s19, 128 }
  0x57   : > { %175 = vst [vmem:[%s171_s17] sm:$0xff] %v174_v2  ;;  %p400_p6 = scmp.ne.s32.totalorder %s643_s19, %s399_s30  ;;  %s473_s13 = smov [#allocation7]  }
  0x58   : > { %s403_s3 = sshll.u32 %s473_s13, 4  ;;  %s404_s3 = int_to_ptr.vmem [resolvable:$false] %s403_s3 }
  0x59   : > { %p401_p9 = pnand %p400_p6, %p581_p8  ;;  %s405_s4 = scalar_lea.vmem %s404_s3, 256 }
  0x5a   : > { %p406_p13 = scmp.lt.s32.totalorder %s643_s19, %s404_s3  ;;  %p407_p0 = scmp.lt.s32.totalorder %s405_s4, %s399_s30 }
  0x5b   : > { %p402_p12 = pneg %p401_p9 }
  0x5c   : > { %p408_p5 = por %p407_p0, %p406_p13 }
  0x5e   : > { %p409_p10 = pnand %p408_p5, %p402_p12 }
  0x60   : > { %412 = shalt.err (!%p409_p10)
}
  0x61   : > { %s413_s5 = scalar_lea.hbm %s648_s27, 128  ;;  %s417_s18 = scalar_lea.hbm %s692_s2, 256 }
  0x62   : > { %p414_p1 = scmp.ne.s32.totalorder %s648_s27, %s413_s5  ;;  %p418_p3 = scmp.lt.u32.totalorder %s648_s27, %s692_s2 }
  0x63   : > { %p419_p4 = scmp.lt.u32.totalorder %s417_s18, %s413_s5  ;;  %p421_p6 = scmp.lt.u32.totalorder %s413_s5, %s648_s27 }
  0x64   : > { %p415_p2 = pnand %p414_p1, %p581_p8 }
  0x65   : > { %p420_p11 = por %p419_p4, %p418_p3 }
  0x66   : > { %p416_p7 = pneg %p415_p2 }
  0x67   : > { %p422_p9 = por %p421_p6, %p420_p11 }
  0x69   : > { %p423_p12 = pnand %p422_p9, %p416_p7 }
  0x6b   : > { %426 = shalt.err (!%p423_p12)
}
  0x6c   : > { %290 = dma.vmem_to_hbm [thread:$0]  (%p581_p8), %s643_s19, 128, %s648_s27, %s177_s29  }
  0x6d PF: > { %s202_s25 = sand.u32 1, %s457_s9   ;;  %p711_p13 = scmp.ne.s32.totalorder %s697_s16, 0 }
  0x6e   : > { %p712_p0 = scmp.ge.s32.totalorder %s469_s12, 2  ;;  %s203_s23 = scalar_lea.sflag [#allocation4], %s202_s25 }
  0x70   : > { %p301_p5 = pnand %p712_p0, %p711_p13 }
  0x72   : > { %452 = dma.done.wait (!%p301_p5), %s203_s23, 128  }
  0x73   : > { %454 = vsyncadd (!%p301_p5), %s203_s23, 4294967168  ;;  %p16_p10 = scmp.ge.s32.totalorder %s537_s20, 4   ;;  %s713_s9 = smov %s461_s10 }
  0x74   : > { %s714_s10 = smov %s465_s11  ;;  %s715_s11 = smov %s573_s7 }
  0x75   : > { %s716_s12 = smov %s537_s20  ;;  %18 = sbr.rel (!%p16_p10) target bundleno = 6 (0x6), region = 77 }
  0x7c   :  { %208 = vsyncpa [#allocation3], 1 }
  0x7d   :  { %210 = vsyncpa [#allocation3 + $0x1], 1 }
  0x7e   :  { %211 = vsyncpa [#allocation6], 1 }
  0x7f   :  { %212 = vsyncpa [#allocation4], 1 }
  0x80   :  { %214 = vsyncpa [#allocation4 + $0x1], 1 }

// kernel: tpu_custom_call.1
= control target key start
LH: loop header
LB: loop body
LE: loop exit
PB: predicated region body
PF: predicated region fallthrough
CT: control target
= control target key end

     0   :  { %10 = vsyncpa [#allocation3], 0  ;;  %s2679_s0 = inlined_call_operand.hbm [shape: f32[128,512], index: 0, kind: input, shape index: {}]   ;;  %s2680_s1 = inlined_call_operand.hbm [shape: bf16[512,128], index: 1, kind: input, shape index: {}]   ;;  %s2681_s2 = inlined_call_operand.vmem [shape: f32[1,128], index: 2, kind: input, shape index: {}]   ;;  %s2682_s3 = inlined_call_operand.hbm [shape: bf16[128,512], index: 3, kind: input, shape index: {}]   ;;  %s2683_s4 = inlined_call_operand.vmem [shape: f32[1,512], index: 4, kind: input, shape index: {}]   ;;  %s2684_s5 = inlined_call_operand.hbm [shape: f32[128,512], index: 5, kind: output, shape index: {}]  }
   0x1   :  { %12 = vsyncpa [#allocation3 + $0x1], 0 }
   0x2   :  { %13 = vsyncpa [#allocation6], 0 }
   0x3   :  { %14 = vsyncpa [#allocation4], 0 }
   0x4   :  { %16 = vsyncpa [#allocation4 + $0x1], 0  ;;  %s2213_s18 = smov 0   ;;  %s2215_s19 = smov 0  }
   0x5   :  { %s2217_s20 = smov 0   ;;  %s2219_s21 = smov 0  }
   0x6 LB: > { %s2234_s22 = sadd.s32 4294967295, %s2168_s21   ;;  %s1492_s23 = sadd.s32 4294967294, %s2168_s21   ;;  %s2168_s21 = sphi %s2219_s21, %s2704_s21   ;;  %s2164_s20 = sphi %s2217_s20, %s2703_s20   ;;  %s2160_s19 = sphi %s2215_s19, %s2702_s19   ;;  %s2156_s18 = sphi %s2213_s18, %s2701_s18  }
   0x7   : > { %p42_p0 = scmp.ne.s32.totalorder %s2160_s19, %s2156_s18  ;;  %p2685_p1 = scmp.eq.s32.totalorder %s2234_s22, 0 }
   0x8   : > { %p156_p3 = scmp.eq.s32.totalorder %s1492_s23, 1  ;;  %p1493_p5 = scmp.ge.s32.totalorder %s2168_s21, 1 }
   0x9   : > { %p2243_p4 = por %p2685_p1, %p42_p0  ;;  %p163_p7 = scmp.lt.s32.totalorder %s2168_s21, 3 }
   0xa   : > { %p2248_p6 = por %p156_p3, %p42_p0  ;;  %s2170_s27 = smov [#allocation5]  }
   0xb   : > { %s2688_s24 = scalar_select %p2243_p4, 1, 0 }
   0xc   : > { %s2689_s25 = scalar_select %p2248_p6, 1, 0 }
   0xd   : > { %p2253_p8 = pnand %p1493_p5, %p163_p7  ;;  %s175_s28 = sshll.u32 %s2170_s27, 4  ;;  %s2257_s28 = int_to_ptr.vmem [resolvable:$true] %s175_s28 }
   0xe   : > { %s2171_s30 = smov [#allocation7]   ;;  %s2012_s9 = scalar_lea.hbm %s2680_s1, 4096 }
   0xf   : > { %p1713_p9 = pneg %p2253_p8  ;;  %s191_s6 = sshll.u32 %s2171_s30, 4  ;;  %s2268_s6 = int_to_ptr.vmem [resolvable:$true] %s191_s6 }
  0x10   : > { %p2013_p12 = scmp.ne.s32.totalorder %s2680_s1, %s2012_s9  ;;  %p2019_p5 = scmp.lt.u32.totalorder %s2012_s9, %s2680_s1 }
  0x11   : > { %p2264_p11 = pnand %p1713_p9, %p2685_p1 }
  0x13   : > { %p2014_p13 = pneg %p2264_p11 }
  0x15   : > { %p2015_p0 = pnand %p2014_p13, %p2013_p12 }
  0x17   : > { %p2016_p3 = pneg %p2015_p0 }
  0x19   : > { %p2021_p7 = pnand %p2019_p5, %p2016_p3 }
  0x1b   : > { %2024 = shalt.err (!%p2021_p7)
}
  0x1c   : > { %s2025_s14 = scalar_lea.vmem %s2257_s28, 4096  ;;  %p2033_p2 = scmp.lt.s32.totalorder %s2257_s28, %s2257_s28 }
  0x1d   : > { %p2026_p9 = scmp.ne.s32.totalorder %s2257_s28, %s2025_s14  ;;  %p2034_p12 = scmp.lt.s32.totalorder %s2025_s14, %s2025_s14 }
  0x1f   : > { %p2028_p10 = pnand %p2026_p9, %p2014_p13  ;;  %p2035_p0 = por %p2034_p12, %p2033_p2 }
  0x21   : > { %p2029_p1 = pneg %p2028_p10 }
  0x23   : > { %p2036_p6 = pnand %p2035_p0, %p2029_p1 }
  0x25   : > { %2039 = shalt.err (!%p2036_p6)
}
  0x26   : > { %s2172_s15 = smov 64   ;;  %s2173_s16 = smov 4  }
  0x27   : > { %1716 = dma.hbm_to_vmem [thread:$0]  (!%p2264_p11), %s2680_s1, 4096, %s2257_s28, [#allocation6], %s2172_s15, %s2172_s15, %s2173_s16  }
  0x28   : > { %s2040_s7 = scalar_lea.hbm %s2682_s3, 4096 }
  0x29   : > { %p2041_p2 = scmp.ne.s32.totalorder %s2682_s3, %s2040_s7  ;;  %p2047_p10 = scmp.lt.u32.totalorder %s2040_s7, %s2682_s3 }
  0x2b   : > { %p2043_p1 = pnand %p2041_p2, %p2014_p13 }
  0x2d   : > { %p2044_p6 = pneg %p2043_p1 }
  0x2f   : > { %p2049_p3 = pnand %p2047_p10, %p2044_p6 }
  0x31   : > { %2052 = shalt.err (!%p2049_p3)
}
  0x32   : > { %s2053_s28 = scalar_lea.vmem %s2268_s6, 4096  ;;  %p2061_p12 = scmp.lt.s32.totalorder %s2268_s6, %s2268_s6 }
  0x33   : > { %p2054_p5 = scmp.ne.s32.totalorder %s2268_s6, %s2053_s28  ;;  %p2062_p0 = scmp.lt.s32.totalorder %s2053_s28, %s2053_s28 }
  0x35   : > { %p2056_p7 = pnand %p2054_p5, %p2014_p13  ;;  %p2063_p2 = por %p2062_p0, %p2061_p12 }
  0x37   : > { %p2057_p9 = pneg %p2056_p7 }
  0x39   : > { %p2064_p1 = pnand %p2063_p2, %p2057_p9 }
  0x3b   : > { %2067 = shalt.err (!%p2064_p1)
}
  0x3c   : > { %s2174_s12 = smov 256   ;;  %s2175_s13 = smov 16  }
  0x3d   : > { %1719 = dma.hbm_to_vmem [thread:$0]  (!%p2264_p11), %s2682_s3, 4096, %s2268_s6, [#allocation6], %s2174_s12, %s2174_s12, %s2175_s13  }
  0x3e   : > { %s2323_s16 = sadd.s32 1, %s2168_s21   ;;  %s29_s23 = sadd.s32 1, %s2164_s20 }
  0x3f   : > { %s26_s17 = ssub.s32 %s2168_s21, %s2323_s16  ;;  %p36_p6 = scmp.ne.s32.totalorder %s2164_s20, %s2160_s19 }
  0x40   : > { %p27_p13 = scmp.eq.s32.totalorder %s26_s17, 0  ;;  %p37_p10 = scmp.eq.s32.totalorder %s2168_s21, 0 }
  0x41   : > { %p2692_p5 = scmp.eq.s32.totalorder %s2234_s22, 1  ;;  %p1730_p9 = scmp.lt.s32.totalorder %s2168_s21, 2 }
  0x42   : > { %s2332_s27 = scalar_select %p27_p13, %s2164_s20, %s29_s23  }
  0x43   : > { %p38_p3 = por %p37_p10, %p36_p6  ;;  %p2336_p7 = por %p2692_p5, %p36_p6 }
  0x44   : > { %s208_s29 = sand.u32 1, %s2164_s20   ;;  %s1618_s6 = sshll.u32 %s2168_s21, 12 }
  0x45   : > { %s2693_s30 = scalar_select %p2336_p7, 1, 0 }
  0x46   : > { %s1497_s7 = sshll.u32 %s208_s29, 8  ;;  %s2346_s10 = scalar_lea.hbm %s2679_s0, %s1618_s6 }
  0x47   : > { %s212_s11 = scalar_lea.vmem [#allocation2], %s1497_s7  ;;  %p2350_p11 = pnand %p1730_p9, %p38_p3 }
  0x48   : > { %s220_s28 = sshll.u32 %s212_s11, 4  ;;  %s2354_s13 = scalar_lea.sflag [#allocation3], %s208_s29  ;;  %s2348_s28 = int_to_ptr.vmem [resolvable:$true] %s220_s28 }
  0x49   : > { %s2068_s14 = scalar_lea.hbm %s2346_s10, 4096  ;;  %p2070_p0 = pneg %p2350_p11 }
  0x4a   : > { %p2069_p12 = scmp.ne.s32.totalorder %s2346_s10, %s2068_s14  ;;  %s2073_s23 = scalar_lea.hbm %s2679_s0, 8192 }
  0x4b   : > { %p2074_p13 = scmp.lt.u32.totalorder %s2346_s10, %s2679_s0  ;;  %p2075_p6 = scmp.lt.u32.totalorder %s2073_s23, %s2068_s14 }
  0x4c   : > { %p2071_p2 = pnand %p2070_p0, %p2069_p12  ;;  %p2077_p3 = scmp.lt.u32.totalorder %s2068_s14, %s2346_s10 }
  0x4d   : > { %p2076_p10 = por %p2075_p6, %p2074_p13 }
  0x4e   : > { %p2072_p1 = pneg %p2071_p2 }
  0x4f   : > { %p2078_p5 = por %p2077_p3, %p2076_p10 }
  0x51   : > { %p2079_p9 = pnand %p2078_p5, %p2072_p1 }
  0x53   : > { %2082 = shalt.err (!%p2079_p9)
}
  0x54   : > { %s2083_s29 = scalar_lea.vmem %s2348_s28, 4096  ;;  %s2176_s8 = smov [#allocation2]  }
  0x55   : > { %p2084_p12 = scmp.ne.s32.totalorder %s2348_s28, %s2083_s29  ;;  %s2088_s9 = sshll.u32 %s2176_s8, 4  ;;  %s2089_s9 = int_to_ptr.vmem [resolvable:$false] %s2088_s9 }
  0x56   : > { %s2090_s11 = scalar_lea.vmem %s2089_s9, 8192  ;;  %p2091_p4 = scmp.lt.s32.totalorder %s2348_s28, %s2089_s9 }
  0x57   : > { %p2086_p2 = pnand %p2084_p12, %p2070_p0  ;;  %p2092_p13 = scmp.lt.s32.totalorder %s2090_s11, %s2083_s29 }
  0x59   : > { %p2087_p7 = pneg %p2086_p2  ;;  %p2093_p6 = por %p2092_p13, %p2091_p4 }
  0x5b   : > { %p2094_p10 = pnand %p2093_p6, %p2087_p7 }
  0x5d   : > { %2097 = shalt.err (!%p2094_p10)
}
  0x5e   : > { %s2177_s14 = smov 512   ;;  %s2178_s15 = smov 32  }
  0x5f   : > { %1723 = dma.hbm_to_vmem [thread:$0]  (!%p2350_p11), %s2346_s10, 4096, %s2348_s28, %s2354_s13, %s2177_s14, %s2177_s14, %s2178_s15  }
  0x60   : > { %232 = sbr.rel (%p2253_p8) target bundleno = 676 (0x2a4), region = 40  ;;  %s2385_s17 = sand.u32 (!%p2253_p8), 1, %s2160_s19  }
  0x61   : > { %s1502_s23 = sshll.u32 (!%p2253_p8), %s2385_s17, 8  ;;  %s235_s7 = scalar_lea.sflag (!%p2253_p8), [#allocation3], %s2385_s17 }
  0x62   : > { %s2391_s6 = scalar_lea.vmem (!%p2253_p8), [#allocation2], %s1502_s23  ;;  %p2695_p4 = scmp.ne.s32.totalorder (!%p2253_p8), %s2688_s24, 0 }
  0x67   : > { %2143 = dma.done.wait (%p2695_p4), %s235_s7, 4096  }
  0x68   : > { %2145 = vsyncadd (%p2695_p4), %s235_s7, 4294963200  ;;  %p2696_p7 = scmp.eq.s32.totalorder %s2234_s22, 0 }
  0x6a   : > { %2147 = dma.done.wait (%p2696_p7), [#allocation6], 8192   ;;  %p2697_p8 = pmov %p2696_p7 }
  0x6b   : > { %v1777_v0 = vld [vmem:[#allocation5 + $0x40] sm:$0xff]   ;;  %v1781_v4 = vld [vmem:[#allocation5 + $0x48] sm:$0xff]   ;;  %v1785_v8 = vld [vmem:[#allocation5 + $0x50] sm:$0xff]   ;;  %s2542_s12 = scalar_lea.vmem [#allocation8], %s1502_s23  ;;  %s1620_s13 = sshll.u32 %s2234_s22, 12 }
  0x6c   : > { %2149 = vsyncadd (%p2697_p8), [#allocation6], 4294959104  ;;  %v1778_v1 = vld [vmem:[#allocation5 + $0xc0] sm:$0xff]   ;;  %1621 = vmatprep.subr.bf16.mxu0 %v1777_v0  ;;  %v1782_v5 = vld [vmem:[#allocation5 + $0xc8] sm:$0xff]   ;;  %s1400_s29 = sshll.u32 %s2542_s12, 4  ;;  %s2625_s9 = scalar_lea.hbm %s2684_s5, %s1620_s13  ;;  %s2627_s29 = int_to_ptr.vmem [resolvable:$true] %s1400_s29 }
  0x6d   : > { %v1779_v2 = vld [vmem:[#allocation5] sm:$0xff]   ;;  %1661 = vmatprep.subr.bf16.mxu1 %v1778_v1  ;;  %v1783_v6 = vld [vmem:[#allocation5 + $0x8] sm:$0xff]   ;;  %v1786_v9 = vld [vmem:[#allocation5 + $0xd0] sm:$0xff]   ;;  %s1386_s11 = scalar_lea.sflag [#allocation4], %s2385_s17  ;;  %s2098_s14 = scalar_lea.vmem %s2627_s29, 4096 }
  0x6e   : > { %v1780_v3 = vld [vmem:[#allocation5 + $0x80] sm:$0xff]   ;;  %1622 = vmatpush3.bf16.msra.mxu0 %v1779_v2  ;;  %v1784_v7 = vld [vmem:[#allocation5 + $0x88] sm:$0xff]   ;;  %v1787_v10 = vld [vmem:[#allocation5 + $0x10] sm:$0xff]   ;;  %p2099_p11 = scmp.ne.s32.totalorder %s2627_s29, %s2098_s14  ;;  %p2698_p0 = scmp.ne.s32.totalorder %s2693_s30, 0 }
  0x6f   : > { %1662 = vmatpush3.bf16.msra.mxu1 %v1780_v3  ;;  %1623 = vmatprep.subr.bf16.mxu0 %v1781_v4  ;;  %v1788_v11 = vld [vmem:[#allocation5 + $0x90] sm:$0xff]   ;;  %v1789_v12 = vld [vmem:[#allocation5 + $0x58] sm:$0xff]   ;;  %v1793_v16 = vld [vmem:[#allocation5 + $0x60] sm:$0xff]   ;;  %s2180_s15 = smov [#allocation8]  }
  0x70   : > { %1663 = vmatprep.subr.bf16.mxu1 %v1782_v5  ;;  %v1790_v13 = vld [vmem:[#allocation5 + $0xd8] sm:$0xff]   ;;  %v1794_v17 = vld [vmem:[#allocation5 + $0xe0] sm:$0xff]   ;;  %v1797_v20 = vld [vmem:[#allocation5 + $0x68] sm:$0xff]   ;;  %p2100_p1 = pnand %p2099_p11, %p2698_p0  ;;  %s2102_s23 = sshll.u32 %s2180_s15, 4  ;;  %s2103_s23 = int_to_ptr.vmem [resolvable:$false] %s2102_s23 }
  0x71   : > { %v1791_v14 = vld [vmem:[#allocation5 + $0x18] sm:$0xff]   ;;  %v1795_v18 = vld [vmem:[#allocation5 + $0x20] sm:$0xff]   ;;  %v1798_v21 = vld [vmem:[#allocation5 + $0xe8] sm:$0xff]   ;;  %s2104_s7 = scalar_lea.vmem %s2103_s23, 8192  ;;  %p2105_p5 = scmp.lt.s32.totalorder %s2627_s29, %s2103_s23 }
  0x72   : > { %1624 = vmatpush3.bf16.msra.mxu0 %v1783_v6  ;;  %v1792_v15 = vld [vmem:[#allocation5 + $0x98] sm:$0xff]   ;;  %v1796_v19 = vld [vmem:[#allocation5 + $0xa0] sm:$0xff]   ;;  %v1799_v22 = vld [vmem:[#allocation5 + $0x28] sm:$0xff]   ;;  %p2101_p3 = pneg %p2100_p1  ;;  %p2106_p9 = scmp.lt.s32.totalorder %s2104_s7, %s2098_s14 }
  0x73   : > { %1664 = vmatpush3.bf16.msra.mxu1 %v1784_v7  ;;  %1625 = vmatprep.subr.bf16.mxu0 %v1785_v8  ;;  %v1800_v23 = vld [vmem:[#allocation5 + $0xa8] sm:$0xff]   ;;  %v1801_v24 = vld [vmem:[#allocation5 + $0x70] sm:$0xff]   ;;  %v1805_v28 = vld [vmem:[#allocation5 + $0x78] sm:$0xff]  }
  0x74   : > { %1665 = vmatprep.subr.bf16.mxu1 %v1786_v9  ;;  %v1802_v25 = vld [vmem:[#allocation5 + $0xf0] sm:$0xff]   ;;  %v1806_v29 = vld [vmem:[#allocation5 + $0xf8] sm:$0xff]   ;;  %v277_v32 = vld [vmem:[%s2391_s6 + $0x8] sm:$0xff]  ;;  %p2107_p12 = por %p2106_p9, %p2105_p5 }
  0x75   : > { %v1803_v26 = vld [vmem:[#allocation5 + $0x30] sm:$0xff]   ;;  %v1807_v30 = vld [vmem:[#allocation5 + $0x38] sm:$0xff]   ;;  %v281_v33 = vld [vmem:[%s2391_s6 + $0x28] sm:$0xff]  ;;  %v1507_v35 = vmul.f32 -1.442695, %v277_v32 }
  0x76   : > { %1626 = vmatpush3.bf16.msra.mxu0 %v1787_v10  ;;  %v1804_v27 = vld [vmem:[#allocation5 + $0xb0] sm:$0xff]   ;;  %v1808_v31 = vld [vmem:[#allocation5 + $0xb8] sm:$0xff]   ;;  %v1511_v36 = vmul.f32 -1.442695, %v281_v33  ;;  %v2406_v38 = vld [vmem:[%s2391_s6] sm:$0xff]  ;;  %p2108_p2 = pnand %p2107_p12, %p2101_p3 }
  0x77   : > { %1666 = vmatpush3.bf16.msra.mxu1 %v1788_v11  ;;  %1627 = vmatprep.subr.bf16.mxu0 %v1789_v12  ;;  %v279_v34 = vld [vmem:[%s2391_s6 + $0x18] sm:$0xff]  ;;  %v280_v41 = vld [vmem:[%s2391_s6 + $0x20] sm:$0xff]  ;;  %v2410_v42 = vld [vmem:[%s2391_s6 + $0x10] sm:$0xff]  ;;  %1857 = vpow2.f32 %v1507_v35  ;;  %v1506_v43 = vmul.f32 -1.442695, %v2406_v38 }
  0x78   : > { %1667 = vmatprep.subr.bf16.mxu1 %v1790_v13  ;;  %v283_v37 = vld [vmem:[%s2391_s6 + $0x38] sm:$0xff]  ;;  %v1509_v39 = vmul.f32 -1.442695, %v279_v34  ;;  %v282_v44 = vld [vmem:[%s2391_s6 + $0x30] sm:$0xff]  ;;  %1859 = vpow2.f32 %v1511_v36  ;;  %v1510_v45 = vmul.f32 -1.442695, %v280_v41 }
  0x79   : > { %v1513_v40 = vmul.f32 -1.442695, %v283_v37  ;;  %v285_v46 = vld [vmem:[%s2391_s6 + $0x48] sm:$0xff]  ;;  %v1508_v47 = vmul.f32 -1.442695, %v2410_v42  ;;  %v287_v50 = vld [vmem:[%s2391_s6 + $0x58] sm:$0xff] }
  0x7a   : > { %1628 = vmatpush3.bf16.msra.mxu0 %v1791_v14  ;;  %1861 = vpow2.f32 %v1509_v39  ;;  %v289_v48 = vld [vmem:[%s2391_s6 + $0x68] sm:$0xff]  ;;  %v1512_v49 = vmul.f32 -1.442695, %v282_v44  ;;  %v1515_v51 = vmul.f32 -1.442695, %v285_v46  ;;  %v291_v52 = vld [vmem:[%s2391_s6 + $0x78] sm:$0xff] }
  0x7b   : > { %1668 = vmatpush3.bf16.msra.mxu1 %v1792_v15  ;;  %1629 = vmatprep.subr.bf16.mxu0 %v1793_v16  ;;  %1863 = vpow2.f32 %v1513_v40  ;;  %v1519_v53 = vmul.f32 -1.442695, %v289_v48  ;;  %v284_v54 = vld [vmem:[%s2391_s6 + $0x40] sm:$0xff]  ;;  %v1517_v55 = vmul.f32 -1.442695, %v287_v50  ;;  %v2424_v14 = vld [vmem:[%s2391_s6 + $0x50] sm:$0xff] }
  0x7c   : > { %1669 = vmatprep.subr.bf16.mxu1 %v1794_v17  ;;  %1865 = vpow2.f32 %v1506_v43  ;;  %v1521_v56 = vmul.f32 -1.442695, %v291_v52  ;;  %v1514_v57 = vmul.f32 -1.442695, %v284_v54  ;;  %v1811_v5 = vld [vmem:[#allocation7 + $0x4] ss:$16 sps:$4 sm:$0xff]  }
  0x7d   : > { %1867 = vpow2.f32 %v1510_v45  ;;  %v2421_v8 = vld [vmem:[%s2391_s6 + $0x60] sm:$0xff]  ;;  %v1814_v9 = vld [vmem:[#allocation7 + $0xc] ss:$16 sps:$4 sm:$0xff]   ;;  %v2427_v17 = vld [vmem:[%s2391_s6 + $0x70] sm:$0xff] }
  0x7e   : > { %1630 = vmatpush3.bf16.msra.mxu0 %v1795_v18  ;;  %1869 = vpow2.f32 %v1508_v47  ;;  %v1520_v32 = vmul.f32 -1.442695, %v2427_v17  ;;  %v2443_v36 = vld [vmem:[%s2391_s6 + $0xb8] sm:$0xff]  ;;  %v2447_v40 = vld [vmem:[%s2391_s6 + $0x80] sm:$0xff]  ;;  %v2455_v48 = vld [vmem:[%s2391_s6 + $0x90] sm:$0xff] }
  0x7f   : > { %1670 = vmatpush3.bf16.msra.mxu1 %v1796_v19  ;;  %1631 = vmatprep.subr.bf16.mxu0 %v1797_v20  ;;  %1871 = vpow2.f32 %v1512_v49  ;;  %v2430_v20 = vld [vmem:[%s2391_s6 + $0x88] sm:$0xff]  ;;  %v2451_v45 = vld [vmem:[%s2391_s6 + $0xa0] sm:$0xff]  ;;  %v1529_v47 = vmul.f32 -1.442695, %v2443_v36  ;;  %v1522_v52 = vmul.f32 -1.442695, %v2447_v40 }
  0x80   : > { %1671 = vmatprep.subr.bf16.mxu1 %v1798_v21  ;;  %1873 = vpow2.f32 %v1515_v51  ;;  %v1523_v35 = vmul.f32 -1.442695, %v2430_v20  ;;  %v1809_v49 = vld [vmem:[#allocation7] ss:$16 sps:$4 sm:$0xff]  }
  0x81   : > { %1875 = vpow2.f32 %v1519_v53  ;;  %v1858_v58 = vpop.eup %1857  ;;  %v2459_v53 = vld [vmem:[%s2391_s6 + $0xb0] sm:$0xff] }
  0x82   : > { %1632 = vmatpush3.bf16.msra.mxu0 %v1799_v22  ;;  %1877 = vpow2.f32 %v1517_v55  ;;  %v1860_v59 = vpop.eup %1859  ;;  %v405_v60 = vadd.f32 1.0, %v1858_v58  ;;  %v1526_v55 = vmul.f32 -1.442695, %v2451_v45 }
  0x83   : > { %1672 = vmatpush3.bf16.msra.mxu1 %v1800_v23  ;;  %1633 = vmatprep.subr.bf16.mxu0 %v1801_v24  ;;  %1879 = vpow2.f32 %v1521_v56  ;;  %v409_v62 = vadd.f32 1.0, %v1860_v59  ;;  %v1518_v23 = vmul.f32 -1.442695, %v2421_v8  ;;  %v2434_v24 = vld [vmem:[%s2391_s6 + $0xa8] sm:$0xff] }
  0x84   : > { %1673 = vmatprep.subr.bf16.mxu1 %v1802_v25  ;;  %v1862_v61 = vpop.eup %1861  ;;  %1881 = vpow2.f32 %v1514_v57  ;;  %v1527_v39 = vmul.f32 -1.442695, %v2434_v24  ;;  %v2463_v56 = vld [vmem:[%s2391_s6 + $0xc8] sm:$0xff] }
  0x85   : > { %v1864_v63 = vpop.eup %1863  ;;  %1883 = vrcp.f32 %v405_v60  ;;  %v407_v0 = vadd.f32 1.0, %v1862_v61  ;;  %v1812_v57 = vld [vmem:[#allocation7 + $0x8] ss:$16 sps:$4 sm:$0xff]   ;;  %v1524_v60 = vmul.f32 -1.442695, %v2455_v48 }
  0x86   : > { %1634 = vmatpush3.bf16.msra.mxu0 %v1803_v26  ;;  %v1866_v1 = vpop.eup %1865  ;;  %1885 = vrcp.f32 %v409_v62  ;;  %v411_v2 = vadd.f32 1.0, %v1864_v63  ;;  %v1528_v62 = vmul.f32 -1.442695, %v2459_v53  ;;  %v2468_v63 = vld [vmem:[%s2391_s6 + $0xe8] sm:$0xff] }
  0x87   : > { %1674 = vmatpush3.bf16.msra.mxu1 %v1804_v27  ;;  %1635 = vmatprep.subr.bf16.mxu0 %v1805_v28  ;;  %v1868_v3 = vpop.eup %1867  ;;  %1887 = vrcp.f32 %v407_v0  ;;  %v404_v4 = vadd.f32 1.0, %v1866_v1  ;;  %v2437_v27 = vld [vmem:[%s2391_s6 + $0x98] sm:$0xff] }
  0x88   : > { %1675 = vmatprep.subr.bf16.mxu1 %v1806_v29  ;;  %v1870_v6 = vpop.eup %1869  ;;  %1889 = vrcp.f32 %v411_v2  ;;  %v408_v7 = vadd.f32 1.0, %v1868_v3  ;;  %v1525_v44 = vmul.f32 -1.442695, %v2437_v27  ;;  %v1531_v2 = vmul.f32 -1.442695, %v2463_v56 }
  0x89   : > { %v1872_v10 = vpop.eup %1871  ;;  %1891 = vrcp.f32 %v404_v4  ;;  %v406_v11 = vadd.f32 1.0, %v1870_v6  ;;  %v1535_v6 = vmul.f32 -1.442695, %v2468_v63 }
  0x8a   : > { %1636 = vmatpush3.bf16.msra.mxu0 %v1807_v30  ;;  %v1874_v12 = vpop.eup %1873  ;;  %1893 = vrcp.f32 %v408_v7  ;;  %v410_v13 = vadd.f32 1.0, %v1872_v10  ;;  %v1516_v30 = vmul.f32 -1.442695, %v2424_v14 }
  0x8b   : > { %1676 = vmatpush3.bf16.msra.mxu1 %v1808_v31  ;;  %1175 = vmatprep.subr.bf16.mxu0 %v1811_v5  ;;  %v1876_v15 = vpop.eup %1875  ;;  %1895 = vrcp.f32 %v406_v11  ;;  %v413_v16 = vadd.f32 1.0, %v1874_v12 }
  0x8c   : > { %1248 = vmatprep.subr.bf16.mxu1 %v1814_v9  ;;  %v1878_v18 = vpop.eup %1877  ;;  %1897 = vrcp.f32 %v410_v13  ;;  %v417_v19 = vadd.f32 1.0, %v1876_v15 }
  0x8d   : > { %v1880_v21 = vpop.eup %1879  ;;  %1899 = vrcp.f32 %v413_v16  ;;  %v415_v22 = vadd.f32 1.0, %v1878_v18 }
  0x8e   : > { %v1882_v25 = vpop.eup %1881  ;;  %1901 = vrcp.f32 %v417_v19  ;;  %v419_v26 = vadd.f32 1.0, %v1880_v21 }
  0x8f   : > { %v1884_v28 = vpop.eup %1883  ;;  %1903 = vrcp.f32 %v415_v22  ;;  %v412_v29 = vadd.f32 1.0, %v1882_v25 }
  0x90   : > { %v1886_v31 = vpop.eup %1885  ;;  %1905 = vrcp.f32 %v419_v26 }
  0x91   : > { %v1888_v33 = vpop.eup %1887  ;;  %v501_v34 = vpack.c.bf16 %v1886_v31, %v1884_v28  ;;  %1907 = vpow2.f32 %v1518_v23 }
  0x92   : > { %v1890_v37 = vpop.eup %1889  ;;  %1909 = vrcp.f32 %v412_v29 }
  0x93   : > { %v1892_v41 = vpop.eup %1891  ;;  %811 = vmatprep.mubr.bf16.mxu0 %v501_v34  ;;  %v503_v43 = vpack.c.bf16 %v1890_v37, %v1888_v33  ;;  %1911 = vpow2.f32 %v1516_v30  ;;  %v2473_v30 = vld [vmem:[%s2391_s6 + $0xd8] sm:$0xff] }
  0x94   : > { %v1894_v46 = vpop.eup %1893  ;;  %1913 = vpow2.f32 %v1520_v32 }
  0x95   : > { %v1896_v50 = vpop.eup %1895  ;;  %876 = vmatprep.mubr.bf16.mxu1 %v503_v43  ;;  %v500_v51 = vpack.c.bf16 %v1894_v46, %v1892_v41  ;;  %1915 = vpow2.f32 %v1523_v35  ;;  %v2476_v35 = vld [vmem:[%s2391_s6 + $0xf8] sm:$0xff]  ;;  %v1533_v41 = vmul.f32 -1.442695, %v2473_v30  ;;  %v2480_v43 = vld [vmem:[%s2391_s6 + $0xc0] sm:$0xff] }
  0x96   : > { %v1898_v54 = vpop.eup %1897  ;;  %1917 = vpow2.f32 %v1527_v39 }
  0x97   : > { %v1900_v58 = vpop.eup %1899  ;;  %812 = vmatmul.mubr.bf16.vlgmr.msra.gmra.mrb[0].mxu0 %v500_v51  ;;  %v502_v59 = vpack.c.bf16 %v1898_v54, %v1896_v50  ;;  %1919 = vpow2.f32 %v1525_v44  ;;  %v1537_v51 = vmul.f32 -1.442695, %v2476_v35 }
  0x98   : > { %v1902_v61 = vpop.eup %1901  ;;  %1921 = vpow2.f32 %v1529_v47  ;;  %1176 = vmatpush1.bf16.msra.mxu0 %v1809_v49  ;;  %v2483_v47 = vld [vmem:[%s2391_s6 + $0xe0] sm:$0xff] }
  0x99   : > { %v1904_v0 = vpop.eup %1903  ;;  %877 = vmatmul.mubr.bf16.vlgmr.msra.gmra.mrb[0].mxu1 %v502_v59  ;;  %v505_v1 = vpack.c.bf16 %v1902_v61, %v1900_v58  ;;  %1923 = vpow2.f32 %v1522_v52  ;;  %v2487_v52 = vld [vmem:[%s2391_s6 + $0xd0] sm:$0xff] }
  0x9a   : > { %v1906_v3 = vpop.eup %1905  ;;  %1925 = vpow2.f32 %v1526_v55  ;;  %1249 = vmatpush1.bf16.msra.mxu1 %v1812_v57  ;;  %v1530_v57 = vmul.f32 -1.442695, %v2480_v43  ;;  %v2491_v58 = vld [vmem:[%s2391_s6 + $0xf0] sm:$0xff] }
  0x9b   : > { %v1908_v4 = vpop.eup %1907  ;;  %819 = vmatprep.mubr.bf16.mxu0 %v505_v1  ;;  %v507_v5 = vpack.c.bf16 %v1906_v3, %v1904_v0  ;;  %1927 = vpow2.f32 %v1524_v60  ;;  %v1534_v60 = vmul.f32 -1.442695, %v2483_v47  ;;  %v1532_v0 = vmul.f32 -1.442695, %v2487_v52 }
  0x9c   : > { %v1910_v7 = vpop.eup %1909  ;;  %v416_v9 = vadd.f32 1.0, %v1908_v4  ;;  %1929 = vpow2.f32 %v1528_v62 }
  0x9d   : > { %v1912_v10 = vpop.eup %1911  ;;  %884 = vmatprep.mubr.bf16.mxu1 %v507_v5  ;;  %1931 = vpow2.f32 %v1531_v2  ;;  %v1536_v2 = vmul.f32 -1.442695, %v2491_v58 }
  0x9e   : > { %v1914_v11 = vpop.eup %1913  ;;  %1933 = vrcp.f32 %v416_v9  ;;  %v414_v12 = vadd.f32 1.0, %v1912_v10 }
  0x9f   : > { %v1916_v13 = vpop.eup %1915  ;;  %v418_v15 = vadd.f32 1.0, %v1914_v11  ;;  %1935 = vpow2.f32 %v1535_v6 }
  0xa0   : > { %v1918_v16 = vpop.eup %1917  ;;  %1937 = vrcp.f32 %v414_v12  ;;  %v421_v18 = vadd.f32 1.0, %v1916_v13 }
  0xa1   : > { %v1920_v19 = vpop.eup %1919  ;;  %1939 = vrcp.f32 %v418_v15  ;;  %v425_v21 = vadd.f32 1.0, %v1918_v16 }
  0xa2   : > { %v1922_v22 = vpop.eup %1921  ;;  %1941 = vrcp.f32 %v421_v18  ;;  %v423_v23 = vadd.f32 1.0, %v1920_v19 }
  0xa3   : > { %v1924_v25 = vpop.eup %1923  ;;  %1943 = vrcp.f32 %v425_v21  ;;  %v427_v26 = vadd.f32 1.0, %v1922_v22 }
  0xa4   : > { %v1926_v28 = vpop.eup %1925  ;;  %1945 = vrcp.f32 %v423_v23  ;;  %v420_v29 = vadd.f32 1.0, %v1924_v25 }
  0xa5   : > { %v1928_v31 = vpop.eup %1927  ;;  %1947 = vrcp.f32 %v427_v26  ;;  %v424_v32 = vadd.f32 1.0, %v1926_v28 }
  0xa6   : > { %v1930_v33 = vpop.eup %1929  ;;  %1949 = vrcp.f32 %v420_v29  ;;  %v422_v34 = vadd.f32 1.0, %v1928_v31 }
  0xa7   : > { %v1932_v37 = vpop.eup %1931  ;;  %1951 = vrcp.f32 %v424_v32  ;;  %v426_v39 = vadd.f32 1.0, %v1930_v33 }
  0xa8   : > { %v1934_v44 = vpop.eup %1933  ;;  %1953 = vrcp.f32 %v422_v34  ;;  %v429_v46 = vadd.f32 1.0, %v1932_v37 }
  0xa9   : > { %v1936_v49 = vpop.eup %1935  ;;  %v504_v50 = vpack.c.bf16 %v1934_v44, %v1910_v7  ;;  %1955 = vrcp.f32 %v426_v39 }
  0xaa   : > { %v1938_v54 = vpop.eup %1937  ;;  %v433_v55 = vadd.f32 1.0, %v1936_v49  ;;  %1957 = vrcp.f32 %v429_v46 }
  0xab   : > { %v1940_v59 = vpop.eup %1939  ;;  %820 = vmatmul.mubr.bf16.gmra.mrb[4].mxu0 %v504_v50  ;;  %1959 = vpow2.f32 %v1533_v41 }
  0xac   : > { %v1942_v61 = vpop.eup %1941  ;;  %v506_v62 = vpack.c.bf16 %v1940_v59, %v1938_v54  ;;  %1961 = vrcp.f32 %v433_v55  ;;  %v1815_v55 = vld [vmem:[#allocation7 + $0x20] ss:$16 sps:$4 sm:$0xff]   ;;  %v1818_v59 = vld [vmem:[#allocation7 + $0x28] ss:$16 sps:$4 sm:$0xff]  }
  0xad   : > { %v1944_v1 = vpop.eup %1943  ;;  %1963 = vpow2.f32 %v1537_v51 }
  0xae   : > { %v1946_v3 = vpop.eup %1945  ;;  %885 = vmatmul.mubr.bf16.gmra.mrb[4].mxu1 %v506_v62  ;;  %v509_v4 = vpack.c.bf16 %v1944_v1, %v1942_v61  ;;  %1965 = vpow2.f32 %v1530_v57  ;;  %v1817_v57 = vld [vmem:[#allocation7 + $0x24] ss:$16 sps:$4 sm:$0xff]   ;;  %v1821_v61 = vld [vmem:[#allocation7 + $0x40] ss:$16 sps:$4 sm:$0xff]   ;;  %v1826_v1 = vld [vmem:[#allocation7 + $0x4c] ss:$16 sps:$4 sm:$0xff]  }
  0xaf   : > { %v1948_v5 = vpop.eup %1947  ;;  %1967 = vpow2.f32 %v1534_v60  ;;  %v1820_v60 = vld [vmem:[#allocation7 + $0x2c] ss:$16 sps:$4 sm:$0xff]   ;;  %1177 = vmatprep.subr.bf16.mxu0 %v1817_v57  ;;  %v1823_v62 = vld [vmem:[#allocation7 + $0x44] ss:$16 sps:$4 sm:$0xff]  }
  0xb0   : > { %v1950_v6 = vpop.eup %1949  ;;  %827 = vmatprep.mubr.bf16.mxu0 %v509_v4  ;;  %v511_v7 = vpack.c.bf16 %v1948_v5, %v1946_v3  ;;  %1969 = vpow2.f32 %v1532_v0  ;;  %1250 = vmatprep.subr.bf16.mxu1 %v1820_v60  ;;  %v1824_v0 = vld [vmem:[#allocation7 + $0x48] ss:$16 sps:$4 sm:$0xff]   ;;  %v1829_v3 = vld [vmem:[#allocation7 + $0x64] ss:$16 sps:$4 sm:$0xff]   ;;  %v1832_v5 = vld [vmem:[#allocation7 + $0x6c] ss:$16 sps:$4 sm:$0xff]  }
  0xb1   : > { %v1952_v9 = vpop.eup %1951  ;;  %1971 = vpow2.f32 %v1536_v2  ;;  %1178 = vmatpush1.bf16.msra.mxu0 %v1815_v55  ;;  %1251 = vmatpush1.bf16.msra.mxu1 %v1818_v59  ;;  %v1827_v2 = vld [vmem:[#allocation7 + $0x60] ss:$16 sps:$4 sm:$0xff]   ;;  %v1830_v4 = vld [vmem:[#allocation7 + $0x68] ss:$16 sps:$4 sm:$0xff]  }
  0xb2   : > { %v1954_v10 = vpop.eup %1953  ;;  %892 = vmatprep.mubr.bf16.mxu1 %v511_v7  ;;  %v508_v11 = vpack.c.bf16 %v1952_v9, %v1950_v6  ;;  %1179 = vmatprep.subr.bf16.mxu0 %v1823_v62  ;;  %v1835_v6 = vld [vmem:[#allocation7 + $0x84] ss:$16 sps:$4 sm:$0xff]   ;;  %v1833_v7 = vld [vmem:[#allocation7 + $0x80] ss:$16 sps:$4 sm:$0xff]   ;;  %v1838_v9 = vld [vmem:[#allocation7 + $0x8c] ss:$16 sps:$4 sm:$0xff]  }
  0xb3   : > { %v1956_v12 = vpop.eup %1955  ;;  %1252 = vmatprep.subr.bf16.mxu1 %v1826_v1 }
  0xb4   : > { %v1958_v13 = vpop.eup %1957  ;;  %828 = vmatmul.mubr.bf16.gmra.mrb[8].mxu0 %v508_v11  ;;  %v510_v15 = vpack.c.bf16 %v1956_v12, %v1954_v10  ;;  %v1836_v10 = vld [vmem:[#allocation7 + $0x88] ss:$16 sps:$4 sm:$0xff]   ;;  %v1839_v11 = vld [vmem:[#allocation7 + $0xa0] ss:$16 sps:$4 sm:$0xff]   ;;  %v1841_v12 = vld [vmem:[#allocation7 + $0xa4] ss:$16 sps:$4 sm:$0xff]  }
  0xb5   : > { %v1960_v16 = vpop.eup %1959  ;;  %1180 = vmatpush1.bf16.msra.mxu0 %v1821_v61  ;;  %1253 = vmatpush1.bf16.msra.mxu1 %v1824_v0 }
  0xb6   : > { %v1962_v18 = vpop.eup %1961  ;;  %893 = vmatmul.mubr.bf16.gmra.mrb[8].mxu1 %v510_v15  ;;  %v431_v19 = vadd.f32 1.0, %v1960_v16  ;;  %1181 = vmatprep.subr.bf16.mxu0 %v1829_v3  ;;  %v1844_v15 = vld [vmem:[#allocation7 + $0xac] ss:$16 sps:$4 sm:$0xff]   ;;  %v1845_v16 = vld [vmem:[#allocation7 + $0xc0] ss:$16 sps:$4 sm:$0xff]  }
  0xb7   : > { %v1964_v21 = vpop.eup %1963  ;;  %v513_v22 = vpack.c.bf16 %v1962_v18, %v1958_v13  ;;  %1254 = vmatprep.subr.bf16.mxu1 %v1832_v5  ;;  %v1842_v13 = vld [vmem:[#allocation7 + $0xa8] ss:$16 sps:$4 sm:$0xff]   ;;  %v1847_v18 = vld [vmem:[#allocation7 + $0xc4] ss:$16 sps:$4 sm:$0xff]  }
  0xb8   : > { %v1966_v23 = vpop.eup %1965  ;;  %v435_v25 = vadd.f32 1.0, %v1964_v21  ;;  %1973 = vrcp.f32 %v431_v19  ;;  %v1848_v19 = vld [vmem:[#allocation7 + $0xc8] ss:$16 sps:$4 sm:$0xff]   ;;  %v1850_v21 = vld [vmem:[#allocation7 + $0xcc] ss:$16 sps:$4 sm:$0xff]  }
  0xb9   : > { %v1968_v26 = vpop.eup %1967  ;;  %835 = vmatprep.mubr.bf16.mxu0 %v513_v22  ;;  %v428_v28 = vadd.f32 1.0, %v1966_v23  ;;  %1182 = vmatpush1.bf16.msra.mxu0 %v1827_v2  ;;  %v1853_v22 = vld [vmem:[#allocation7 + $0xe4] ss:$16 sps:$4 sm:$0xff]   ;;  %v1856_v23 = vld [vmem:[#allocation7 + $0xec] ss:$16 sps:$4 sm:$0xff]  }
  0xba   : > { %v1970_v29 = vpop.eup %1969  ;;  %1975 = vrcp.f32 %v435_v25  ;;  %v432_v31 = vadd.f32 1.0, %v1968_v26  ;;  %1255 = vmatpush1.bf16.msra.mxu1 %v1830_v4  ;;  %1183 = vmatprep.subr.bf16.mxu0 %v1835_v6  ;;  %v1851_v25 = vld [vmem:[#allocation7 + $0xe0] ss:$16 sps:$4 sm:$0xff]   ;;  %v1854_v26 = vld [vmem:[#allocation7 + $0xe8] ss:$16 sps:$4 sm:$0xff]  }
  0xbb   : > { %v1972_v32 = vpop.eup %1971  ;;  %1977 = vrcp.f32 %v428_v28  ;;  %v430_v33 = vadd.f32 1.0, %v1970_v29  ;;  %1256 = vmatprep.subr.bf16.mxu1 %v1838_v9  ;;  %v2179_v28 = vmov 0  }
  0xbc   : > { %1979 = vrcp.f32 %v432_v31  ;;  %v434_v34 = vadd.f32 1.0, %v1972_v32  ;;  %v2501_v31 = vld [vmem:[%s2681_s2] ss:$0 sm:$0xff] }
  0xbd   : > { %1981 = vrcp.f32 %v430_v33  ;;  %1184 = vmatpush1.bf16.msra.mxu0 %v1833_v7 }
  0xbe   : > { %1983 = vrcp.f32 %v434_v34  ;;  %1257 = vmatpush1.bf16.msra.mxu1 %v1836_v10  ;;  %1185 = vmatprep.subr.bf16.mxu0 %v1841_v12 }
  0xbf   : > { %1258 = vmatprep.subr.bf16.mxu1 %v1844_v15 }
  0xc1   : > { %1186 = vmatpush1.bf16.msra.mxu0 %v1839_v11 }
  0xc2   : > { %v1974_v37 = vpop.eup %1973  ;;  %1259 = vmatpush1.bf16.msra.mxu1 %v1842_v13  ;;  %1187 = vmatprep.subr.bf16.mxu0 %v1847_v18 }
  0xc3   : > { %1260 = vmatprep.subr.bf16.mxu1 %v1850_v21 }
  0xc4   : > { %v1976_v39 = vpop.eup %1975 }
  0xc5   : > { %v1978_v41 = vpop.eup %1977  ;;  %v515_v44 = vpack.c.bf16 %v1976_v39, %v1974_v37  ;;  %1188 = vmatpush1.bf16.msra.mxu0 %v1845_v16 }
  0xc6   : > { %v1980_v46 = vpop.eup %1979  ;;  %1261 = vmatpush1.bf16.msra.mxu1 %v1848_v19  ;;  %1189 = vmatprep.subr.bf16.mxu0 %v1853_v22 }
  0xc7   : > { %v1982_v49 = vpop.eup %1981  ;;  %900 = vmatprep.mubr.bf16.mxu1 %v515_v44  ;;  %v512_v50 = vpack.c.bf16 %v1980_v46, %v1978_v41  ;;  %1262 = vmatprep.subr.bf16.mxu1 %v1856_v23 }
  0xc8   : > { %v1984_v51 = vpop.eup %1983 }
  0xc9   : > { %836 = vmatmul.mubr.bf16.gmra.mrb[12].mxu0 %v512_v50  ;;  %v514_v54 = vpack.c.bf16 %v1984_v51, %v1982_v49 }
  0xca   : > { %1190 = vmatpush1.bf16.msra.mxu0 %v1851_v25  ;;  %1263 = vmatpush1.bf16.msra.mxu1 %v1854_v26 }
  0xcb   : > { %901 = vmatmul.mubr.bf16.gmra.mrb[12].mxu1 %v514_v54  ;;  %1207 = vmatprep.mubr.bf16.mxu0 %v2179_v28 }
  0xcc   : > { %1280 = vmatprep.mubr.bf16.mxu1 %v2179_v28 }
 0x16a   : > { %v1637_v29 = vpop.f32.mrb[0].mxu0 }
 0x16b   : > { %v1638_v32 = vpop.f32.mrb[1].mxu0 }
 0x16c   : > { %v1677_v33 = vpop.f32.mrb[0].mxu1  ;;  %v1639_v34 = vadd.f32 %v1638_v32, %v1637_v29  ;;  %v1640_v37 = vpop.f32.mrb[2].mxu0 }
 0x16d   : > { %v1678_v39 = vpop.f32.mrb[1].mxu1  ;;  %v1641_v41 = vpop.f32.mrb[3].mxu0 }
 0x16e   : > { %v814_v44 = vadd.f32 %v1639_v34, %v2501_v31  ;;  %v1679_v46 = vadd.f32 %v1678_v39, %v1677_v33  ;;  %v1680_v49 = vpop.f32.mrb[2].mxu1  ;;  %v1642_v50 = vadd.f32 %v1641_v41, %v1640_v37 }
 0x16f   : > { %v1681_v51 = vpop.f32.mrb[3].mxu1 }
 0x170   : > { %v879_v54 = vadd.f32 %v1679_v46, %v814_v44  ;;  %v817_v55 = vadd.f32 %v1642_v50, %v2501_v31  ;;  %v1682_v57 = vadd.f32 %v1681_v51, %v1680_v49 }
 0x172   : > { %v917_v59 = vmin.f32 %v879_v54, 0.0  ;;  %v882_v60 = vadd.f32 %v1682_v57, %v817_v55  ;;  %vm909_vm0 = vcmp.gt.f32.partialorder %v879_v54, 0.0 }
 0x174   : > { %v925_v61 = vmul.f32 1.442695, %v917_v59  ;;  %v918_v62 = vmin.f32 %v882_v60, 0.0  ;;  %vm910_vm1 = vcmp.gt.f32.partialorder %v882_v60, 0.0 }
 0x176   : > { %1985 = vpow2.f32 %v925_v61  ;;  %v927_v0 = vmul.f32 1.442695, %v918_v62 }
 0x178   : > { %1987 = vpow2.f32 %v927_v0 }
 0x17e   : > { %v1643_v1 = vpop.f32.mrb[4].mxu0 }
 0x17f   : > { %v1644_v2 = vpop.f32.mrb[5].mxu0 }
 0x180   : > { %v1986_v3 = vpop.eup %1985  ;;  %v1645_v4 = vadd.f32 %v1644_v2, %v1643_v1  ;;  %v1646_v5 = vpop.f32.mrb[6].mxu0 }
 0x181   : > { %v1571_v6 = vadd.f32 -1.0, %v1986_v3  ;;  %v1683_v7 = vpop.f32.mrb[4].mxu1  ;;  %v1647_v9 = vpop.f32.mrb[7].mxu0 }
 0x182   : > { %v1988_v10 = vpop.eup %1987  ;;  %v822_v11 = vadd.f32 %v1645_v4, %v2501_v31  ;;  %v1684_v12 = vpop.f32.mrb[5].mxu1  ;;  %v1648_v13 = vadd.f32 %v1647_v9, %v1646_v5 }
 0x183   : > { %v1572_v15 = vadd.f32 -1.0, %v1988_v10  ;;  %v1685_v16 = vadd.f32 %v1684_v12, %v1683_v7  ;;  %v1686_v18 = vpop.f32.mrb[6].mxu1  ;;  %v949_v22 = vsel %vm909_vm0, %v879_v54, %v1571_v6 }
 0x184   : > { %v825_v19 = vadd.f32 %v1648_v13, %v2501_v31  ;;  %v1687_v21 = vpop.f32.mrb[7].mxu1 }
 0x185   : > { %v950_v23 = vsel %vm910_vm1, %v882_v60, %v1572_v15  ;;  %v887_v25 = vadd.f32 %v1685_v16, %v822_v11  ;;  %v1688_v26 = vadd.f32 %v1687_v21, %v1686_v18 }
 0x186   : > { %v957_v29 = vpack.c.bf16 %v950_v23, %v949_v22 }
 0x187   : > { %v919_v32 = vmin.f32 %v887_v25, 0.0  ;;  %v890_v33 = vadd.f32 %v1688_v26, %v825_v19  ;;  %v1649_v34 = vpop.f32.mrb[8].mxu0  ;;  %vm911_vm2 = vcmp.gt.f32.partialorder %v887_v25, 0.0 }
 0x188   : > { %v1650_v37 = vpop.f32.mrb[9].mxu0  ;;  %1208 = vmatmul.mubr.bf16.vlgmr.msra.gmra.mrb[16].mxu0 %v957_v29  ;;  %1281 = vmatmul.mubr.bf16.vlgmr.msra.gmra.mrb[16].mxu1 %v957_v29 }
 0x189   : > { %v929_v39 = vmul.f32 1.442695, %v919_v32  ;;  %v920_v41 = vmin.f32 %v890_v33, 0.0  ;;  %v1689_v44 = vpop.f32.mrb[8].mxu1  ;;  %v1651_v46 = vadd.f32 %v1650_v37, %v1649_v34  ;;  %v1652_v49 = vpop.f32.mrb[10].mxu0  ;;  %1217 = vmatprep.mubr.bf16.mxu0 %v2179_v28  ;;  %1290 = vmatprep.mubr.bf16.mxu1 %v2179_v28  ;;  %vm912_vm3 = vcmp.gt.f32.partialorder %v890_v33, 0.0 }
 0x18a   : > { %v1690_v50 = vpop.f32.mrb[9].mxu1  ;;  %v1653_v51 = vpop.f32.mrb[11].mxu0 }
 0x18b   : > { %1989 = vpow2.f32 %v929_v39  ;;  %v931_v54 = vmul.f32 1.442695, %v920_v41  ;;  %v830_v55 = vadd.f32 %v1651_v46, %v2501_v31  ;;  %v1691_v57 = vadd.f32 %v1690_v50, %v1689_v44  ;;  %v1692_v59 = vpop.f32.mrb[10].mxu1 }
 0x18c   : > { %v1654_v60 = vadd.f32 %v1653_v51, %v1652_v49  ;;  %v1693_v61 = vpop.f32.mrb[11].mxu1 }
 0x18d   : > { %1991 = vpow2.f32 %v931_v54  ;;  %v895_v62 = vadd.f32 %v1691_v57, %v830_v55  ;;  %v1694_v0 = vadd.f32 %v1693_v61, %v1692_v59 }
 0x18e   : > { %v833_v1 = vadd.f32 %v1654_v60, %v2501_v31 }
 0x18f   : > { %v921_v2 = vmin.f32 %v895_v62, 0.0  ;;  %vm913_vm4 = vcmp.gt.f32.partialorder %v895_v62, 0.0 }
 0x190   : > { %v898_v3 = vadd.f32 %v1694_v0, %v833_v1 }
 0x191   : > { %v933_v4 = vmul.f32 1.442695, %v921_v2 }
 0x192   : > { %v922_v5 = vmin.f32 %v898_v3, 0.0  ;;  %vm914_vm5 = vcmp.gt.f32.partialorder %v898_v3, 0.0 }
 0x193   : > { %1993 = vpow2.f32 %v933_v4 }
 0x194   : > { %v935_v6 = vmul.f32 1.442695, %v922_v5 }
 0x195   : > { %v1990_v7 = vpop.eup %1989 }
 0x196   : > { %1995 = vpow2.f32 %v935_v6  ;;  %v1573_v9 = vadd.f32 -1.0, %v1990_v7  ;;  %v995_v6 = vlaneseq }
 0x197   : > { %v1992_v10 = vpop.eup %1991 }
 0x198   : > { %v1574_v11 = vadd.f32 -1.0, %v1992_v10  ;;  %v951_v12 = vsel %vm911_vm2, %v887_v25, %v1573_v9  ;;  %v996_v7 = vshrl.u32 %v995_v6, 7 }
 0x19a   : > { %v952_v13 = vsel %vm912_vm3, %v890_v33, %v1574_v11  ;;  %v997_v9 = vsub.s32 0, %v996_v7  ;;  %v1005_v10 = vsub.s32 2, %v996_v7  ;;  %v1001_v11 = vsub.s32 1, %v996_v7 }
 0x19b   : > { %v958_v15 = vpack.c.bf16 %v952_v13, %v951_v12  ;;  %v1009_v12 = vsub.s32 3, %v996_v7 }
 0x19c   : > { %v1655_v16 = vpop.f32.mrb[12].mxu0 }
 0x19d   : > { %v1994_v18 = vpop.eup %1993  ;;  %v1656_v19 = vpop.f32.mrb[13].mxu0  ;;  %1218 = vmatmul.mubr.bf16.gmra.mrb[20].mxu0 %v958_v15  ;;  %1291 = vmatmul.mubr.bf16.gmra.mrb[20].mxu1 %v958_v15 }
 0x19e   : > { %v1695_v21 = vpop.f32.mrb[12].mxu1  ;;  %v1657_v22 = vadd.f32 %v1656_v19, %v1655_v16  ;;  %v1658_v23 = vpop.f32.mrb[14].mxu0  ;;  %1227 = vmatprep.mubr.bf16.mxu0 %v2179_v28  ;;  %1300 = vmatprep.mubr.bf16.mxu1 %v2179_v28  ;;  %v1575_v32 = vadd.f32 -1.0, %v1994_v18 }
 0x19f   : > { %v1696_v26 = vpop.f32.mrb[13].mxu1  ;;  %v1659_v29 = vpop.f32.mrb[15].mxu0 }
 0x1a0   : > { %v1996_v34 = vpop.eup %1995  ;;  %v838_v25 = vadd.f32 %v1657_v22, %v2501_v31  ;;  %v1697_v33 = vadd.f32 %v1696_v26, %v1695_v21  ;;  %v1698_v37 = vpop.f32.mrb[14].mxu1  ;;  %v1660_v39 = vadd.f32 %v1659_v29, %v1658_v23  ;;  %v953_v51 = vsel %vm913_vm4, %v895_v62, %v1575_v32 }
 0x1a1   : > { %v1699_v41 = vpop.f32.mrb[15].mxu1  ;;  %v1576_v44 = vadd.f32 -1.0, %v1996_v34 }
 0x1a2   : > { %v903_v46 = vadd.f32 %v1697_v33, %v838_v25  ;;  %v841_v49 = vadd.f32 %v1660_v39, %v2501_v31  ;;  %v1700_v50 = vadd.f32 %v1699_v41, %v1698_v37 }
 0x1a3   : > { %v954_v54 = vsel %vm914_vm5, %v898_v3, %v1576_v44 }
 0x1a4   : > { %v923_v55 = vmin.f32 %v903_v46, 0.0  ;;  %v906_v57 = vadd.f32 %v1700_v50, %v841_v49  ;;  %v959_v59 = vpack.c.bf16 %v954_v54, %v953_v51  ;;  %vm915_vm6 = vcmp.gt.f32.partialorder %v903_v46, 0.0  ;;  %v2001_v50 = vld [vmem:[%s2391_s6 + $0x8] sm:$0xff]  ;;  %v2002_v54 = vld [vmem:[%s2391_s6 + $0x18] sm:$0xff] }
 0x1a6   : > { %v937_v60 = vmul.f32 1.442695, %v923_v55  ;;  %v924_v61 = vmin.f32 %v906_v57, 0.0  ;;  %1228 = vmatmul.mubr.bf16.gmra.mrb[24].mxu0 %v959_v59  ;;  %1301 = vmatmul.mubr.bf16.gmra.mrb[24].mxu1 %v959_v59  ;;  %vm916_vm7 = vcmp.gt.f32.partialorder %v906_v57, 0.0 }
 0x1a7   : > { %1237 = vmatprep.mubr.bf16.mxu0 %v2179_v28  ;;  %1310 = vmatprep.mubr.bf16.mxu1 %v2179_v28  ;;  %v993_v28 = vld [vmem:[%s2683_s4] sm:$0xf] }
 0x1a8   : > { %1997 = vpow2.f32 %v937_v60  ;;  %v939_v0 = vmul.f32 1.442695, %v924_v61  ;;  %v2520_v13 = vrot.slane %v993_v28, %v997_v9  ;;  %v2522_v15 = vrot.slane %v993_v28, %v1005_v10  ;;  %v2004_v60 = vld [vmem:[%s2391_s6 + $0x30] sm:$0xff] }
 0x1a9   : > { %v2524_v16 = vrot.slane %v993_v28, %v1001_v11  ;;  %v2526_v18 = vrot.slane %v993_v28, %v1009_v12  ;;  %v2007_v12 = vld [vmem:[%s2391_s6 + $0x40] sm:$0xff] }
 0x1aa   : > { %1999 = vpow2.f32 %v939_v0  ;;  %v2005_v0 = vld [vmem:[%s2391_s6 + $0x28] sm:$0xff] }
 0x1b2   : > { %v1998_v1 = vpop.eup %1997 }
 0x1b3   : > { %v1577_v2 = vadd.f32 -1.0, %v1998_v1 }
 0x1b4   : > { %v2000_v31 = vpop.eup %1999 }
 0x1b5   : > { %v1578_v4 = vadd.f32 -1.0, %v2000_v31  ;;  %v955_v62 = vsel %vm915_vm6, %v903_v46, %v1577_v2  ;;  %v2006_v2 = vld [vmem:[%s2391_s6 + $0x38] sm:$0xff] }
 0x1b7   : > { %v956_v3 = vsel %vm916_vm7, %v906_v57, %v1578_v4 }
 0x1b8   : > { %v960_v5 = vpack.c.bf16 %v956_v3, %v955_v62 }
 0x1ba   : > { %1238 = vmatmul.mubr.bf16.gmra.mrb[28].mxu0 %v960_v5  ;;  %1311 = vmatmul.mubr.bf16.gmra.mrb[28].mxu1 %v960_v5 }
 0x25b   : > { %v1209_v19 = vpop.f32.mrb[16].mxu0  ;;  %v1282_v21 = vpop.f32.mrb[16].mxu1 }
 0x25c   : > { %v1210_v22 = vadd.f32 %v1209_v19, %v2520_v13  ;;  %v1283_v23 = vadd.f32 %v1282_v21, %v2522_v15  ;;  %v1211_v26 = vpop.f32.mrb[17].mxu0  ;;  %v1284_v29 = vpop.f32.mrb[17].mxu1 }
 0x25d   : > { %v1212_v32 = vadd.f32 %v1211_v26, %v2524_v16  ;;  %v1285_v34 = vadd.f32 %v1284_v29, %v2526_v18  ;;  %v1213_v25 = vpop.f32.mrb[18].mxu0  ;;  %v1286_v33 = vpop.f32.mrb[18].mxu1 }
 0x25e   : > { %v1321_v37 = vadd.f32 %v1210_v22, %v2406_v38  ;;  %v1323_v39 = vadd.f32 %v1283_v23, %v2410_v42  ;;  %v1214_v41 = vadd.f32 %v1213_v25, %v2520_v13  ;;  %v1287_v44 = vadd.f32 %v1286_v33, %v2522_v15  ;;  %v1215_v46 = vpop.f32.mrb[19].mxu0  ;;  %v1288_v49 = vpop.f32.mrb[19].mxu1  ;;  %v2003_v38 = vld [vmem:[%s2391_s6 + $0x20] sm:$0xff]  ;;  %v2009_v25 = vld [vmem:[%s2391_s6 + $0x58] sm:$0xff] }
 0x25f   : > { %v1322_v51 = vadd.f32 %v2001_v50, %v1212_v32  ;;  %v1324_v55 = vadd.f32 %v2002_v54, %v1285_v34  ;;  %v1216_v57 = vadd.f32 %v1215_v46, %v2524_v16  ;;  %v1289_v59 = vadd.f32 %v1288_v49, %v2526_v18  ;;  %v2008_v32 = vld [vmem:[%s2391_s6 + $0x48] sm:$0xff]  ;;  %v2011_v49 = vld [vmem:[%s2391_s6 + $0x78] sm:$0xff] }
 0x260   : > { %1353 = vst [vmem:[%s2542_s12] sm:$0xff] %v1321_v37  ;;  %1355 = vst [vmem:[%s2542_s12 + $0x10] sm:$0xff] %v1323_v39  ;;  %v1325_v42 = vadd.f32 %v2003_v38, %v1214_v41  ;;  %v1327_v61 = vadd.f32 %v2004_v60, %v1287_v44  ;;  %v2010_v44 = vld [vmem:[%s2391_s6 + $0x68] sm:$0xff] }
 0x261   : > { %1354 = vst [vmem:[%s2542_s12 + $0x8] sm:$0xff] %v1322_v51  ;;  %1356 = vst [vmem:[%s2542_s12 + $0x18] sm:$0xff] %v1324_v55  ;;  %v1326_v1 = vadd.f32 %v2005_v0, %v1216_v57  ;;  %v1328_v31 = vadd.f32 %v2006_v2, %v1289_v59 }
 0x262   : > { %1357 = vst [vmem:[%s2542_s12 + $0x20] sm:$0xff] %v1325_v42  ;;  %1359 = vst [vmem:[%s2542_s12 + $0x30] sm:$0xff] %v1327_v61 }
 0x263   : > { %1358 = vst [vmem:[%s2542_s12 + $0x28] sm:$0xff] %v1326_v1  ;;  %1360 = vst [vmem:[%s2542_s12 + $0x38] sm:$0xff] %v1328_v31 }
 0x270   : > { %v1219_v4 = vpop.f32.mrb[20].mxu0  ;;  %v1292_v62 = vpop.f32.mrb[20].mxu1 }
 0x271   : > { %v1220_v3 = vadd.f32 %v1219_v4, %v2520_v13  ;;  %v1293_v5 = vadd.f32 %v1292_v62, %v2522_v15  ;;  %v1221_v6 = vpop.f32.mrb[21].mxu0  ;;  %v1294_v7 = vpop.f32.mrb[21].mxu1 }
 0x272   : > { %v1222_v9 = vadd.f32 %v1221_v6, %v2524_v16  ;;  %v1295_v10 = vadd.f32 %v1294_v7, %v2526_v18  ;;  %v1223_v28 = vpop.f32.mrb[22].mxu0  ;;  %v1296_v11 = vpop.f32.mrb[22].mxu1 }
 0x273   : > { %v1329_v19 = vadd.f32 %v2007_v12, %v1220_v3  ;;  %v1331_v21 = vadd.f32 %v1293_v5, %v2424_v14  ;;  %v1224_v22 = vadd.f32 %v1223_v28, %v2520_v13  ;;  %v1297_v23 = vadd.f32 %v1296_v11, %v2522_v15  ;;  %v1225_v26 = vpop.f32.mrb[23].mxu0  ;;  %v1298_v29 = vpop.f32.mrb[23].mxu1 }
 0x274   : > { %v1330_v34 = vadd.f32 %v2008_v32, %v1222_v9  ;;  %v1332_v33 = vadd.f32 %v2009_v25, %v1295_v10  ;;  %v1226_v37 = vadd.f32 %v1225_v26, %v2524_v16  ;;  %v1299_v14 = vadd.f32 %v1298_v29, %v2526_v18 }
 0x275   : > { %1361 = vst [vmem:[%s2542_s12 + $0x40] sm:$0xff] %v1329_v19  ;;  %1363 = vst [vmem:[%s2542_s12 + $0x50] sm:$0xff] %v1331_v21  ;;  %v1333_v39 = vadd.f32 %v1224_v22, %v2421_v8  ;;  %v1335_v41 = vadd.f32 %v1297_v23, %v2427_v17 }
 0x276   : > { %1362 = vst [vmem:[%s2542_s12 + $0x48] sm:$0xff] %v1330_v34  ;;  %1364 = vst [vmem:[%s2542_s12 + $0x58] sm:$0xff] %v1332_v33  ;;  %v1334_v46 = vadd.f32 %v2010_v44, %v1226_v37  ;;  %v1336_v50 = vadd.f32 %v2011_v49, %v1299_v14 }
 0x277   : > { %1365 = vst [vmem:[%s2542_s12 + $0x60] sm:$0xff] %v1333_v39  ;;  %1367 = vst [vmem:[%s2542_s12 + $0x70] sm:$0xff] %v1335_v41 }
 0x278   : > { %1366 = vst [vmem:[%s2542_s12 + $0x68] sm:$0xff] %v1334_v46  ;;  %1368 = vst [vmem:[%s2542_s12 + $0x78] sm:$0xff] %v1336_v50 }
 0x279   : > { %v1229_v51 = vpop.f32.mrb[24].mxu0  ;;  %v1302_v54 = vpop.f32.mrb[24].mxu1 }
 0x27a   : > { %v1230_v55 = vadd.f32 %v1229_v51, %v2520_v13  ;;  %v1303_v57 = vadd.f32 %v1302_v54, %v2522_v15  ;;  %v1231_v59 = vpop.f32.mrb[25].mxu0  ;;  %v1304_v8 = vpop.f32.mrb[25].mxu1 }
 0x27b   : > { %v1232_v17 = vadd.f32 %v1231_v59, %v2524_v16  ;;  %v1305_v38 = vadd.f32 %v1304_v8, %v2526_v18  ;;  %v1233_v42 = vpop.f32.mrb[26].mxu0  ;;  %v1306_v60 = vpop.f32.mrb[26].mxu1 }
 0x27c   : > { %v1337_v61 = vadd.f32 %v1230_v55, %v2447_v40  ;;  %v1339_v0 = vadd.f32 %v1303_v57, %v2455_v48  ;;  %v1234_v1 = vadd.f32 %v1233_v42, %v2520_v13  ;;  %v1307_v2 = vadd.f32 %v1306_v60, %v2522_v15  ;;  %v1235_v31 = vpop.f32.mrb[27].mxu0  ;;  %v1308_v4 = vpop.f32.mrb[27].mxu1 }
 0x27d   : > { %v1338_v62 = vadd.f32 %v1232_v17, %v2430_v20  ;;  %v1340_v3 = vadd.f32 %v1305_v38, %v2437_v27  ;;  %v1236_v5 = vadd.f32 %v1235_v31, %v2524_v16  ;;  %v1309_v40 = vadd.f32 %v1308_v4, %v2526_v18 }
 0x27e   : > { %1369 = vst [vmem:[%s2542_s12 + $0x80] sm:$0xff] %v1337_v61  ;;  %1371 = vst [vmem:[%s2542_s12 + $0x90] sm:$0xff] %v1339_v0  ;;  %v1341_v48 = vadd.f32 %v1234_v1, %v2451_v45  ;;  %v1343_v6 = vadd.f32 %v1307_v2, %v2459_v53 }
 0x27f   : > { %1370 = vst [vmem:[%s2542_s12 + $0x88] sm:$0xff] %v1338_v62  ;;  %1372 = vst [vmem:[%s2542_s12 + $0x98] sm:$0xff] %v1340_v3  ;;  %v1342_v7 = vadd.f32 %v1236_v5, %v2434_v24  ;;  %v1344_v9 = vadd.f32 %v1309_v40, %v2443_v36 }
 0x280   : > { %1373 = vst [vmem:[%s2542_s12 + $0xa0] sm:$0xff] %v1341_v48  ;;  %1375 = vst [vmem:[%s2542_s12 + $0xb0] sm:$0xff] %v1343_v6 }
 0x281   : > { %1374 = vst [vmem:[%s2542_s12 + $0xa8] sm:$0xff] %v1342_v7  ;;  %1376 = vst [vmem:[%s2542_s12 + $0xb8] sm:$0xff] %v1344_v9 }
 0x28d   : > { %v1239_v20 = vpop.f32.mrb[28].mxu0  ;;  %v1312_v27 = vpop.f32.mrb[28].mxu1 }
 0x28e   : > { %v1240_v10 = vadd.f32 %v1239_v20, %v2520_v13  ;;  %v1313_v45 = vadd.f32 %v1312_v27, %v2522_v15  ;;  %v1241_v28 = vpop.f32.mrb[29].mxu0  ;;  %v1314_v53 = vpop.f32.mrb[29].mxu1 }
 0x28f   : > { %v1242_v11 = vadd.f32 %v1241_v28, %v2524_v16  ;;  %v1315_v24 = vadd.f32 %v1314_v53, %v2526_v18  ;;  %v1243_v36 = vpop.f32.mrb[30].mxu0  ;;  %v1316_v12 = vpop.f32.mrb[30].mxu1 }
 0x290   : > { %v1345_v19 = vadd.f32 %v1240_v10, %v2480_v43  ;;  %v1347_v21 = vadd.f32 %v1313_v45, %v2487_v52  ;;  %v1244_v22 = vadd.f32 %v1243_v36, %v2520_v13  ;;  %v1317_v23 = vadd.f32 %v1316_v12, %v2522_v15  ;;  %v1245_v26 = vpop.f32.mrb[31].mxu0  ;;  %v1318_v29 = vpop.f32.mrb[31].mxu1 }
 0x291   : > { %v1346_v32 = vadd.f32 %v1242_v11, %v2463_v56  ;;  %v1348_v34 = vadd.f32 %v1315_v24, %v2473_v30  ;;  %v1246_v43 = vadd.f32 %v1245_v26, %v2524_v16  ;;  %v1319_v52 = vadd.f32 %v1318_v29, %v2526_v18 }
 0x292   : > { %1377 = vst [vmem:[%s2542_s12 + $0xc0] sm:$0xff] %v1345_v19  ;;  %1379 = vst [vmem:[%s2542_s12 + $0xd0] sm:$0xff] %v1347_v21  ;;  %v1349_v13 = vadd.f32 %v1244_v22, %v2483_v47  ;;  %v1351_v15 = vadd.f32 %v1317_v23, %v2491_v58 }
 0x293   : > { %1378 = vst [vmem:[%s2542_s12 + $0xc8] sm:$0xff] %v1346_v32  ;;  %1380 = vst [vmem:[%s2542_s12 + $0xd8] sm:$0xff] %v1348_v34  ;;  %v1350_v56 = vadd.f32 %v1246_v43, %v2468_v63  ;;  %v1352_v30 = vadd.f32 %v1319_v52, %v2476_v35 }
 0x294   : > { %1381 = vst [vmem:[%s2542_s12 + $0xe0] sm:$0xff] %v1349_v13  ;;  %1383 = vst [vmem:[%s2542_s12 + $0xf0] sm:$0xff] %v1351_v15 }
 0x295   : > { %1382 = vst [vmem:[%s2542_s12 + $0xe8] sm:$0xff] %v1350_v56  ;;  %1384 = vst [vmem:[%s2542_s12 + $0xf8] sm:$0xff] %v1352_v30 }
 0x296   : > { %2111 = shalt.err (!%p2108_p2)
}
 0x297   : > { %s2112_s6 = scalar_lea.hbm %s2625_s9, 4096  ;;  %s2116_s10 = scalar_lea.hbm %s2684_s5, 8192 }
 0x298   : > { %p2113_p13 = scmp.ne.s32.totalorder %s2625_s9, %s2112_s6  ;;  %p2117_p4 = scmp.lt.u32.totalorder %s2625_s9, %s2684_s5 }
 0x299   : > { %p2118_p7 = scmp.lt.u32.totalorder %s2116_s10, %s2112_s6  ;;  %p2120_p11 = scmp.lt.u32.totalorder %s2112_s6, %s2625_s9 }
 0x29a   : > { %p2114_p6 = pnand %p2113_p13, %p2698_p0 }
 0x29b   : > { %p2119_p8 = por %p2118_p7, %p2117_p4 }
 0x29c   : > { %p2115_p10 = pneg %p2114_p6 }
 0x29d   : > { %p2121_p1 = por %p2120_p11, %p2119_p8 }
 0x29f   : > { %p2122_p3 = pnand %p2121_p1, %p2115_p10 }
 0x2a1   : > { %2125 = shalt.err (!%p2122_p3)
}
 0x2a2   : > { %s2181_s13 = smov 512   ;;  %s2182_s22 = smov 32  }
 0x2a3   : > { %1711 = dma.vmem_to_hbm [thread:$0]  (%p2698_p0), %s2627_s29, 4096, %s2625_s9, %s1386_s11, %s2181_s13, %s2181_s13, %s2182_s22  }
 0x2a4 PF: > { %s1415_s8 = sand.u32 1, %s2156_s18   ;;  %p2699_p5 = scmp.ne.s32.totalorder %s2689_s25, 0 }
 0x2a5   : > { %p2700_p9 = scmp.ge.s32.totalorder %s2168_s21, 2  ;;  %s1416_s14 = scalar_lea.sflag [#allocation4], %s1415_s8 }
 0x2a7   : > { %p1725_p12 = pnand %p2700_p9, %p2699_p5 }
 0x2a9   : > { %2151 = dma.done.wait (!%p1725_p12), %s1416_s14, 4096  }
 0x2aa   : > { %2153 = vsyncadd (!%p1725_p12), %s1416_s14, 4294963200  ;;  %p19_p2 = scmp.ge.s32.totalorder %s2323_s16, 4   ;;  %s2701_s18 = smov %s2160_s19 }
 0x2ab   : > { %s2702_s19 = smov %s2164_s20  ;;  %s2703_s20 = smov %s2332_s27 }
 0x2ac   : > { %s2704_s21 = smov %s2323_s16  ;;  %21 = sbr.rel (!%p19_p2) target bundleno = 6 (0x6), region = 93 }
 0x2b3   :  { %1421 = vsyncpa [#allocation3], 1 }
 0x2b4   :  { %1423 = vsyncpa [#allocation3 + $0x1], 1 }
 0x2b5   :  { %1424 = vsyncpa [#allocation6], 1 }
 0x2b6   :  { %1425 = vsyncpa [#allocation4], 1 }
 0x2b7   :  { %1427 = vsyncpa [#allocation4 + $0x1], 1 }

</bundles_post_ra>
